<compile_context>
chip_gen: v5e
topology: v5e:2x2
jax: 0.10.0
libtpu: 0.0.40
codegen_flags: <defaults>
</compile_context>

<pallas_src>
import functools

import jax
import jax.numpy as jnp
from jax import lax
from jax.experimental import pallas as pl
from jax.experimental.pallas import tpu as pltpu


def _round_up(x, m):
    return ((x + m - 1) // m) * m


def _feature_major(a, n_pad, dtype):
    """[B, F] -> [F, n_pad]  (features on sublanes, batch on lanes), zero padded."""
    a_t = a.T.astype(dtype)
    return jnp.pad(a_t, ((0, 0), (0, n_pad - a_t.shape[1])))


# ------------------------------------------------------------------------------------------
# Kernel 1: fused per-edge compute (edges on lanes).
#   rij (3, T) f32 | h_row, h_col (D, T), edge_attr (E, T) in MXU dtype
#   -> message (D, T) f32, f = rij * coord_net(message) (3, T) f32
# ------------------------------------------------------------------------------------------
def _edge_kernel(rij_ref, hrow_ref, hcol_ref, ea_ref,
                 w1g_ref, w1hr_ref, w1hc_ref, w1ea_ref, b1_ref, w2_ref, b2_ref,
                 wc1_ref, bc1_ref, wc2_ref, bc2_ref,
                 msg_ref, f_ref, *, norm):
    cdt = w2_ref.dtype                               # MXU compute dtype (bf16 or f32)
    rij = rij_ref[...].astype(jnp.float32)           # (3, T)

    # InvariantScalarNet gram for K=1:  ||rij||^2  -> (1, T)
    gram = jnp.sum(rij * rij, axis=0, keepdims=True)
    if norm:
        # F.normalize(p=2, dim=-1) of a length-1 vector: g / max(|g|, 1e-12),
        # expressed via rsqrt on the squared norm (EUP slot, no VPU divide).
        gram = gram * lax.rsqrt(jnp.maximum(gram * gram, 1e-24))

    # First Linear of the edge-message MLP; the concat([gram, h_row, h_col, edge_attr])
    # is folded into split weights (no in-kernel concatenate).
    hid = (jnp.dot(w1hr_ref[...], hrow_ref[...], preferred_element_type=jnp.float32)
           + jnp.dot(w1hc_ref[...], hcol_ref[...], preferred_element_type=jnp.float32)
           + jnp.dot(w1ea_ref[...], ea_ref[...], preferred_element_type=jnp.float32)
           + w1g_ref[...] * gram                     # rank-1 gram contribution (f32 VPU)
           + b1_ref[...])
    hid = hid * jax.nn.sigmoid(hid)                  # SiLU, f32
    msg = (jnp.dot(w2_ref[...], hid.astype(cdt), preferred_element_type=jnp.float32)
           + b2_ref[...])                            # (D, T)

    # coord_net: Linear -> SiLU -> Linear -> (1, T)
    ch = (jnp.dot(wc1_ref[...], msg.astype(cdt), preferred_element_type=jnp.float32)
          + bc1_ref[...])
    ch = ch * jax.nn.sigmoid(ch)
    cm = (jnp.dot(wc2_ref[...], ch.astype(cdt), preferred_element_type=jnp.float32)
          + bc2_ref[...])                            # (1, T)

    msg_ref[...] = msg.astype(msg_ref.dtype)
    f_ref[...] = (rij * cm).astype(f_ref.dtype)


# ------------------------------------------------------------------------------------------
# Kernel 2: node update  h + node_net(cat(h, tot_message))  (nodes on lanes).
# ------------------------------------------------------------------------------------------
def _node_h_kernel(h_ref, totm_ref, w1h_ref, w1m_ref, b1_ref, w2_ref, b2_ref, o_ref):
    cdt = w2_ref.dtype
    h32 = h_ref[...].astype(jnp.float32)             # f32 copy kept for the residual add
    hid = (jnp.dot(w1h_ref[...], h32.astype(cdt), preferred_element_type=jnp.float32)
           + jnp.dot(w1m_ref[...], totm_ref[...], preferred_element_type=jnp.float32)
           + b1_ref[...])
    hid = hid * jax.nn.sigmoid(hid)
    delta = (jnp.dot(w2_ref[...], hid.astype(cdt), preferred_element_type=jnp.float32)
             + b2_ref[...])
    o_ref[...] = (h32 + delta).astype(o_ref.dtype)


# ------------------------------------------------------------------------------------------
# Kernel 3: node_v_net(h)  -> (1, T)  (nodes on lanes).
# ------------------------------------------------------------------------------------------
def _node_v_kernel(h_ref, w1_ref, b1_ref, w2_ref, b2_ref, o_ref):
    cdt = w1_ref.dtype
    hid = (jnp.dot(w1_ref[...], h_ref[...], preferred_element_type=jnp.float32)
           + b1_ref[...])
    hid = hid * jax.nn.sigmoid(hid)
    o_ref[...] = (jnp.dot(w2_ref[...], hid.astype(cdt), preferred_element_type=jnp.float32)
                  + b2_ref[...]).astype(o_ref.dtype)


# ------------------------------------------------------------------------------------------
# Wrapper mirroring EGNN_Layer.forward.
# ------------------------------------------------------------------------------------------
def egnn_layer_forward(x, h, edge_index, edge_attr, params, v=None, *,
                       norm=True, h_update=True,
                       block_edges=1024, block_nodes=1024,
                       mxu_dtype=jnp.bfloat16):
    """Returns (x, v, h), matching the PyTorch EGNN_Layer.forward."""
    p = params
    x = x.astype(jnp.float32)
    h = h.astype(jnp.float32)
    edge_attr = edge_attr.astype(jnp.float32)
    N, D = h.shape
    M, E = edge_attr.shape

    row = edge_index[0].astype(jnp.int32)
    col = edge_index[1].astype(jnp.int32)

    # Data-dependent gathers stay in XLA.
    rij = x[row] - x[col]                            # (M, 3)
    h_row = h[row]                                   # (M, D)
    h_col = h[col]

    # ---------------- fused per-edge kernel ----------------
    te = min(_round_up(block_edges, 128), _round_up(M, 128))
    m_pad = _round_up(M, te)

    rij_t = _feature_major(rij, m_pad, jnp.float32)
    hrow_t = _feature_major(h_row, m_pad, mxu_dtype)
    hcol_t = _feature_major(h_col, m_pad, mxu_dtype)
    ea_t = _feature_major(edge_attr, m_pad, mxu_dtype)

    # Split edge-message first Linear along its input: feat = [gram(1), h_row(D), h_col(D), ea(E)]
    w1 = p['msg_w1'].astype(jnp.float32)             # (D, 1 + 2D + E), torch (out, in) layout
    w1_g = w1[:, 0:1]                                # kept f32 (rank-1 VPU term)
    w1_hr = w1[:, 1:1 + D].astype(mxu_dtype)
    w1_hc = w1[:, 1 + D:1 + 2 * D].astype(mxu_dtype)
    w1_ea = w1[:, 1 + 2 * D:].astype(mxu_dtype)
    b1 = p['msg_b1'].reshape(D, 1).astype(jnp.float32)
    w2 = p['msg_w2'].astype(mxu_dtype)
    b2 = p['msg_b2'].reshape(D, 1).astype(jnp.float32)
    wc1 = p['coord_w1'].astype(mxu_dtype)
    bc1 = p['coord_b1'].reshape(D, 1).astype(jnp.float32)
    wc2 = p['coord_w2'].astype(mxu_dtype)
    bc2 = p['coord_b2'].reshape(1, 1).astype(jnp.float32)

    edge_spec = lambda f: pl.BlockSpec((f, te), lambda i: (0, i))
    resident = lambda s: pl.BlockSpec(s, lambda i: (0, 0))

    msg_t, f_t = pl.pallas_call(
        functools.partial(_edge_kernel, norm=norm),
        out_shape=(jax.ShapeDtypeStruct((D, m_pad), jnp.float32),
                   jax.ShapeDtypeStruct((3, m_pad), jnp.float32)),
        grid_spec=pltpu.PrefetchScalarGridSpec(
            num_scalar_prefetch=0,
            grid=(m_pad // te,),
            in_specs=[
                edge_spec(3), edge_spec(D), edge_spec(D), edge_spec(E),
                resident((D, 1)), resident((D, D)), resident((D, D)), resident((D, E)),
                resident((D, 1)), resident((D, D)), resident((D, 1)),
                resident((D, D)), resident((D, 1)), resident((1, D)), resident((1, 1)),
            ],
            out_specs=[edge_spec(D), edge_spec(3)],
        ),
        compiler_params=pltpu.CompilerParams(dimension_semantics=("parallel",)),
    )(rij_t, hrow_t, hcol_t, ea_t,
      w1_g, w1_hr, w1_hc, w1_ea, b1, w2, b2, wc1, bc1, wc2, bc2)

    message = msg_t.T[:M]                            # (M, D)
    f = f_t.T[:M]                                    # (M, 3)

    # ---------------- aggregation (data-dependent scatter) in XLA ----------------
    f_sum = jax.ops.segment_sum(f, row, num_segments=N)
    deg = jax.ops.segment_sum(jnp.ones((M, 1), jnp.float32), row, num_segments=N)
    tot_f = f_sum / jnp.maximum(deg, 1.0)            # MEAN aggregation, count clamped >= 1
    tot_f = jnp.clip(tot_f, -100.0, 100.0)

    # ---------------- node updates ----------------
    tn = min(_round_up(block_nodes, 128), _round_up(N, 128))
    n_pad = _round_up(N, tn)
    node_spec = lambda f: pl.BlockSpec((f, tn), lambda i: (0, i))

    if v is not None:
        h_v = _feature_major(h, n_pad, mxu_dtype)
        wv1 = p['vel_w1'].astype(mxu_dtype)
        bv1 = p['vel_b1'].reshape(D, 1).astype(jnp.float32)
        wv2 = p['vel_w2'].astype(mxu_dtype)
        bv2 = p['vel_b2'].reshape(1, 1).astype(jnp.float32)
        nv_t = pl.pallas_call(
            _node_v_kernel,
            out_shape=jax.ShapeDtypeStruct((1, n_pad), jnp.float32),
            grid_spec=pltpu.PrefetchScalarGridSpec(
                num_scalar_prefetch=0,
                grid=(n_pad // tn,),
                in_specs=[node_spec(D),
                          resident((D, D)), resident((D, 1)),
                          resident((1, D)), resident((1, 1))],
                out_specs=node_spec(1),
            ),
            compiler_params=pltpu.CompilerParams(dimension_semantics=("parallel",)),
        )(h_v, wv1, bv1, wv2, bv2)
        x_new = x + nv_t.T[:N] * v.astype(jnp.float32) + tot_f
    else:
        x_new = x + tot_f

    tot_message = jax.ops.segment_sum(message, row, num_segments=N)

    if h_update:
        h_t = _feature_major(h, n_pad, jnp.float32)      # f32 needed for the residual add
        totm_t = _feature_major(tot_message, n_pad, mxu_dtype)
        wn1 = p['node_w1'].astype(jnp.float32)           # (D, 2D): split into [h | tot_message]
        wn1_h = wn1[:, :D].astype(mxu_dtype)
        wn1_m = wn1[:, D:].astype(mxu_dtype)
        bn1 = p['node_b1'].reshape(D, 1).astype(jnp.float32)
        wn2 = p['node_w2'].astype(mxu_dtype)
        bn2 = p['node_b2'].reshape(D, 1).astype(jnp.float32)
        hnew_t = pl.pallas_call(
            _node_h_kernel,
            out_shape=jax.ShapeDtypeStruct((D, n_pad), jnp.float32),
            grid_spec=pltpu.PrefetchScalarGridSpec(
                num_scalar_prefetch=0,
                grid=(n_pad // tn,),
                in_specs=[node_spec(D), node_spec(D),
                          resident((D, D)), resident((D, D)), resident((D, 1)),
                          resident((D, D)), resident((D, 1))],
                out_specs=node_spec(D),
            ),
            compiler_params=pltpu.CompilerParams(dimension_semantics=("parallel",)),
        )(h_t, totm_t, wn1_h, wn1_m, bn1, wn2, bn2)
        h_new = hnew_t.T[:N]
    else:
        h_new = h

    return x_new, v, h_new


# ------------------------------------------------------------------------------------------
# Pure-JAX reference mirroring the PyTorch forward (for the self-check).
# ------------------------------------------------------------------------------------------
def _silu(x):
    return x * jax.nn.sigmoid(x)


def _mlp2_ref(x, w1, b1, w2, b2):
    # torch.nn.Linear layout: weight (out, in); y = x @ W^T + b
    return jnp.dot(_silu(jnp.dot(x, w1.T) + b1), w2.T) + b2


def egnn_layer_reference(x, h, edge_index, edge_attr, params, v=None, *,
                         norm=True, h_update=True):
    p = params
    row = edge_index[0].astype(jnp.int32)
    col = edge_index[1].astype(jnp.int32)
    rij = x[row] - x[col]
    hij = jnp.concatenate([h[row], h[col], edge_attr], axis=-1)

    # InvariantScalarNet with K = 1
    Z = rij[:, :, None]                                       # (M, 3, 1)
    K = Z.shape[-1]
    gram = jnp.einsum('bij,bjk->bik', jnp.swapaxes(Z, -1, -2), Z).reshape(-1, K * K)
    if norm:
        nrm = jnp.linalg.norm(gram, axis=-1, keepdims=True)
        gram = gram / jnp.maximum(nrm, 1e-12)
    feat = jnp.concatenate([gram, hij], axis=-1)
    message = _mlp2_ref(feat, p['msg_w1'], p['msg_b1'], p['msg_w2'], p['msg_b2'])
    coord_message = _mlp2_ref(message, p['coord_w1'], p['coord_b1'], p['coord_w2'], p['coord_b2'])
    f = rij * coord_message

    N = x.shape[0]
    f_sum = jax.ops.segment_sum(f, row, num_segments=N)
    cnt = jax.ops.segment_sum(jnp.ones_like(f), row, num_segments=N)
    tot_f = jnp.clip(f_sum / jnp.maximum(cnt, 1.0), -100.0, 100.0)

    if v is not None:
        x = x + _mlp2_ref(h, p['vel_w1'], p['vel_b1'], p['vel_w2'], p['vel_b2']) * v + tot_f
    else:
        x = x + tot_f

    tot_message = jax.ops.segment_sum(message, row, num_segments=N)
    node_message = jnp.concatenate([h, tot_message], axis=-1)
    if h_update:
        h = h + _mlp2_ref(node_message, p['node_w1'], p['node_b1'], p['node_w2'], p['node_b2'])
    return x, v, h


if __name__ == "__main__":
    # Small graph consistent with the module: N nodes (3-D coords), M directed edges,
    # lifting_dim D, E edge features; with_v=True, h_update=True, norm=True.
    N_NODES, M_EDGES, D_LIFT, E_FEAT = 50, 300, 32, 8

    key = jax.random.PRNGKey(0)
    ks = jax.random.split(key, 14)

    x = jax.random.normal(ks[0], (N_NODES, 3), jnp.float32)
    h = jax.random.normal(ks[1], (N_NODES, D_LIFT), jnp.float32)
    v = 0.1 * jax.random.normal(ks[2], (N_NODES, 3), jnp.float32)
    edge_attr = jax.random.normal(ks[3], (M_EDGES, E_FEAT), jnp.float32)
    row = jax.random.randint(ks[4], (M_EDGES,), 0, N_NODES, dtype=jnp.int32)
    col = jax.random.randint(ks[5], (M_EDGES,), 0, N_NODES, dtype=jnp.int32)
    edge_index = jnp.stack([row, col], axis=0)

    def _linear(k, out_dim, in_dim):
        kw, kb = jax.random.split(k)
        scale = 1.0 / (in_dim ** 0.5)
        return (scale * jax.random.normal(kw, (out_dim, in_dim), jnp.float32),
                0.01 * jax.random.normal(kb, (out_dim,), jnp.float32))

    f_in = 1 + 2 * D_LIFT + E_FEAT                    # InvariantScalarNet input: K*K + 2D + E
    msg_w1, msg_b1 = _linear(ks[6], D_LIFT, f_in)
    msg_w2, msg_b2 = _linear(ks[7], D_LIFT, D_LIFT)
    coord_w1, coord_b1 = _linear(ks[8], D_LIFT, D_LIFT)
    coord_w2, coord_b2 = _linear(ks[9], 1, D_LIFT)
    node_w1, node_b1 = _linear(ks[10], D_LIFT, 2 * D_LIFT)
    node_w2, node_b2 = _linear(ks[11], D_LIFT, D_LIFT)
    vel_w1, vel_b1 = _linear(ks[12], D_LIFT, D_LIFT)
    vel_w2, vel_b2 = _linear(ks[13], 1, D_LIFT)
    params = dict(msg_w1=msg_w1, msg_b1=msg_b1, msg_w2=msg_w2, msg_b2=msg_b2,
                  coord_w1=coord_w1, coord_b1=coord_b1, coord_w2=coord_w2, coord_b2=coord_b2,
                  node_w1=node_w1, node_b1=node_b1, node_w2=node_w2, node_b2=node_b2,
                  vel_w1=vel_w1, vel_b1=vel_b1, vel_w2=vel_w2, vel_b2=vel_b2)

    ref_x, _, ref_h = jax.block_until_ready(
        egnn_layer_reference(x, h, edge_index, edge_attr, params, v=v,
                             norm=True, h_update=True))

    # 1) f32-MXU path: strict correctness check against the reference.
    fwd_f32 = jax.jit(functools.partial(egnn_layer_forward, norm=True, h_update=True,
                                        mxu_dtype=jnp.float32))
    x32, _, h32 = jax.block_until_ready(fwd_f32(x, h, edge_index, edge_attr, params, v))
    assert x32.shape == (N_NODES, 3) and h32.shape == (N_NODES, D_LIFT)
    assert jnp.allclose(x32, ref_x, atol=5e-3, rtol=5e-3), float(jnp.max(jnp.abs(x32 - ref_x)))
    assert jnp.allclose(h32, ref_h, atol=5e-3, rtol=5e-3), float(jnp.max(jnp.abs(h32 - ref_h)))

    # 2) bf16-MXU performance path (f32 accumulate / elementwise): looser sanity check.
    fwd_bf16 = jax.jit(functools.partial(egnn_layer_forward, norm=True, h_update=True,
                                         mxu_dtype=jnp.bfloat16))
    xbf, _, hbf = jax.block_until_ready(fwd_bf16(x, h, edge_index, edge_attr, params, v))
    assert jnp.allclose(xbf, ref_x, atol=1e-1, rtol=1e-1), float(jnp.max(jnp.abs(xbf - ref_x)))
    assert jnp.allclose(hbf, ref_h, atol=1e-1, rtol=1e-1), float(jnp.max(jnp.abs(hbf - ref_h)))

    print("KERNEL_OK")
</pallas_src>

<mosaic_0001>
module attributes {stable_mosaic.version = 11 : i64} {
  func.func @_edge_kernel(%arg0: i32, %arg1: memref<3x384xf32, #tpu.memory_space<vmem>>, %arg2: memref<32x384xf32, #tpu.memory_space<vmem>>, %arg3: memref<32x384xf32, #tpu.memory_space<vmem>>, %arg4: memref<8x384xf32, #tpu.memory_space<vmem>>, %arg5: memref<32x1xf32, #tpu.memory_space<vmem>>, %arg6: memref<32x32xf32, #tpu.memory_space<vmem>>, %arg7: memref<32x32xf32, #tpu.memory_space<vmem>>, %arg8: memref<32x8xf32, #tpu.memory_space<vmem>>, %arg9: memref<32x1xf32, #tpu.memory_space<vmem>>, %arg10: memref<32x32xf32, #tpu.memory_space<vmem>>, %arg11: memref<32x1xf32, #tpu.memory_space<vmem>>, %arg12: memref<32x32xf32, #tpu.memory_space<vmem>>, %arg13: memref<32x1xf32, #tpu.memory_space<vmem>>, %arg14: memref<1x32xf32, #tpu.memory_space<vmem>>, %arg15: memref<1x1xf32, #tpu.memory_space<vmem>>, %arg16: memref<32x384xf32, #tpu.memory_space<vmem>>, %arg17: memref<3x384xf32, #tpu.memory_space<vmem>>) attributes {dimension_semantics = [#tpu.dimension_semantics<parallel>], iteration_bounds = array<i64: 1>, scalar_prefetch = 0 : i64, scratch_operands = 0 : i64, tpu.core_type = #tpu.core_type<tc>, window_params = [{transform_indices = @transform_0, window_bounds = array<i64: 3, 384>}, {transform_indices = @transform_1, window_bounds = array<i64: 32, 384>}, {transform_indices = @transform_2, window_bounds = array<i64: 32, 384>}, {transform_indices = @transform_3, window_bounds = array<i64: 8, 384>}, {pipeline_mode = #tpu.pipeline_mode<synchronous>, transform_indices = @transform_4, window_bounds = array<i64: 32, 1>}, {pipeline_mode = #tpu.pipeline_mode<synchronous>, transform_indices = @transform_5, window_bounds = array<i64: 32, 32>}, {pipeline_mode = #tpu.pipeline_mode<synchronous>, transform_indices = @transform_6, window_bounds = array<i64: 32, 32>}, {pipeline_mode = #tpu.pipeline_mode<synchronous>, transform_indices = @transform_7, window_bounds = array<i64: 32, 8>}, {pipeline_mode = #tpu.pipeline_mode<synchronous>, transform_indices = @transform_8, window_bounds = array<i64: 32, 1>}, {pipeline_mode = #tpu.pipeline_mode<synchronous>, transform_indices = @transform_9, window_bounds = array<i64: 32, 32>}, {pipeline_mode = #tpu.pipeline_mode<synchronous>, transform_indices = @transform_10, window_bounds = array<i64: 32, 1>}, {pipeline_mode = #tpu.pipeline_mode<synchronous>, transform_indices = @transform_11, window_bounds = array<i64: 32, 32>}, {pipeline_mode = #tpu.pipeline_mode<synchronous>, transform_indices = @transform_12, window_bounds = array<i64: 32, 1>}, {pipeline_mode = #tpu.pipeline_mode<synchronous>, transform_indices = @transform_13, window_bounds = array<i64: 1, 32>}, {pipeline_mode = #tpu.pipeline_mode<synchronous>, transform_indices = @transform_14, window_bounds = array<i64: 1, 1>}, {transform_indices = @transform_15, window_bounds = array<i64: 32, 384>}, {transform_indices = @transform_16, window_bounds = array<i64: 3, 384>}]} {
    %c0 = arith.constant 0 : index
    %c0_0 = arith.constant 0 : index
    %0 = vector.load %arg1[%c0, %c0_0] : memref<3x384xf32, #tpu.memory_space<vmem>>, vector<3x384xf32>
    %1 = arith.mulf %0, %0 : vector<3x384xf32>
    %cst = arith.constant dense<0.000000e+00> : vector<384xf32>
    %2 = vector.multi_reduction <add>, %1, %cst [0] : vector<3x384xf32> to vector<384xf32>
    %3 = vector.shape_cast %2 : vector<384xf32> to vector<1x384xf32>
    %4 = arith.mulf %3, %3 : vector<1x384xf32>
    %cst_1 = arith.constant 1.000000e-24 : f32
    %5 = vector.broadcast %cst_1 : f32 to vector<1x384xf32>
    %6 = arith.maximumf %4, %5 : vector<1x384xf32>
    %7 = math.rsqrt %6 : vector<1x384xf32>
    %8 = arith.mulf %3, %7 : vector<1x384xf32>
    %c0_2 = arith.constant 0 : index
    %c0_3 = arith.constant 0 : index
    %9 = vector.load %arg6[%c0_2, %c0_3] : memref<32x32xf32, #tpu.memory_space<vmem>>, vector<32x32xf32>
    %c0_4 = arith.constant 0 : index
    %c0_5 = arith.constant 0 : index
    %10 = vector.load %arg2[%c0_4, %c0_5] : memref<32x384xf32, #tpu.memory_space<vmem>>, vector<32x384xf32>
    %cst_6 = arith.constant dense<0.000000e+00> : vector<32x384xf32>
    %11 = tpu.matmul %9, %10, %cst_6 {dimension_numbers = #tpu.dot_dimension_numbers<[1], [0], [0], [1], [0, 0, 1, 1], [], []>} : vector<32x32xf32>, vector<32x384xf32>, vector<32x384xf32> -> vector<32x384xf32>
    %c0_7 = arith.constant 0 : index
    %c0_8 = arith.constant 0 : index
    %12 = vector.load %arg7[%c0_7, %c0_8] : memref<32x32xf32, #tpu.memory_space<vmem>>, vector<32x32xf32>
    %c0_9 = arith.constant 0 : index
    %c0_10 = arith.constant 0 : index
    %13 = vector.load %arg3[%c0_9, %c0_10] : memref<32x384xf32, #tpu.memory_space<vmem>>, vector<32x384xf32>
    %cst_11 = arith.constant dense<0.000000e+00> : vector<32x384xf32>
    %14 = tpu.matmul %12, %13, %cst_11 {dimension_numbers = #tpu.dot_dimension_numbers<[1], [0], [0], [1], [0, 0, 1, 1], [], []>} : vector<32x32xf32>, vector<32x384xf32>, vector<32x384xf32> -> vector<32x384xf32>
    %15 = arith.addf %11, %14 : vector<32x384xf32>
    %c0_12 = arith.constant 0 : index
    %c0_13 = arith.constant 0 : index
    %16 = vector.load %arg8[%c0_12, %c0_13] : memref<32x8xf32, #tpu.memory_space<vmem>>, vector<32x8xf32>
    %c0_14 = arith.constant 0 : index
    %c0_15 = arith.constant 0 : index
    %17 = vector.load %arg4[%c0_14, %c0_15] : memref<8x384xf32, #tpu.memory_space<vmem>>, vector<8x384xf32>
    %cst_16 = arith.constant dense<0.000000e+00> : vector<32x384xf32>
    %18 = tpu.matmul %16, %17, %cst_16 {dimension_numbers = #tpu.dot_dimension_numbers<[1], [0], [0], [1], [0, 0, 1, 1], [], []>} : vector<32x8xf32>, vector<8x384xf32>, vector<32x384xf32> -> vector<32x384xf32>
    %19 = arith.addf %15, %18 : vector<32x384xf32>
    %c0_17 = arith.constant 0 : index
    %c0_18 = arith.constant 0 : index
    %20 = vector.load %arg5[%c0_17, %c0_18] : memref<32x1xf32, #tpu.memory_space<vmem>>, vector<32x1xf32>
    %21 = vector.broadcast %20 : vector<32x1xf32> to vector<32x384xf32>
    %22 = vector.broadcast %8 : vector<1x384xf32> to vector<32x384xf32>
    %23 = arith.mulf %21, %22 : vector<32x384xf32>
    %24 = arith.addf %19, %23 : vector<32x384xf32>
    %c0_19 = arith.constant 0 : index
    %c0_20 = arith.constant 0 : index
    %25 = vector.load %arg9[%c0_19, %c0_20] : memref<32x1xf32, #tpu.memory_space<vmem>>, vector<32x1xf32>
    %26 = vector.broadcast %25 : vector<32x1xf32> to vector<32x384xf32>
    %27 = arith.addf %24, %26 : vector<32x384xf32>
    %28 = arith.negf %27 : vector<32x384xf32>
    %29 = math.exp %28 : vector<32x384xf32>
    %cst_21 = arith.constant 1.000000e+00 : f32
    %30 = vector.broadcast %cst_21 : f32 to vector<32x384xf32>
    %31 = arith.addf %30, %29 : vector<32x384xf32>
    %32 = arith.divf %30, %31 : vector<32x384xf32>
    %33 = arith.mulf %27, %32 : vector<32x384xf32>
    %c0_22 = arith.constant 0 : index
    %c0_23 = arith.constant 0 : index
    %34 = vector.load %arg10[%c0_22, %c0_23] : memref<32x32xf32, #tpu.memory_space<vmem>>, vector<32x32xf32>
    %cst_24 = arith.constant dense<0.000000e+00> : vector<32x384xf32>
    %35 = tpu.matmul %34, %33, %cst_24 {dimension_numbers = #tpu.dot_dimension_numbers<[1], [0], [0], [1], [0, 0, 1, 1], [], []>} : vector<32x32xf32>, vector<32x384xf32>, vector<32x384xf32> -> vector<32x384xf32>
    %c0_25 = arith.constant 0 : index
    %c0_26 = arith.constant 0 : index
    %36 = vector.load %arg11[%c0_25, %c0_26] : memref<32x1xf32, #tpu.memory_space<vmem>>, vector<32x1xf32>
    %37 = vector.broadcast %36 : vector<32x1xf32> to vector<32x384xf32>
    %38 = arith.addf %35, %37 : vector<32x384xf32>
    %c0_27 = arith.constant 0 : index
    %c0_28 = arith.constant 0 : index
    %39 = vector.load %arg12[%c0_27, %c0_28] : memref<32x32xf32, #tpu.memory_space<vmem>>, vector<32x32xf32>
    %cst_29 = arith.constant dense<0.000000e+00> : vector<32x384xf32>
    %40 = tpu.matmul %39, %38, %cst_29 {dimension_numbers = #tpu.dot_dimension_numbers<[1], [0], [0], [1], [0, 0, 1, 1], [], []>} : vector<32x32xf32>, vector<32x384xf32>, vector<32x384xf32> -> vector<32x384xf32>
    %c0_30 = arith.constant 0 : index
    %c0_31 = arith.constant 0 : index
    %41 = vector.load %arg13[%c0_30, %c0_31] : memref<32x1xf32, #tpu.memory_space<vmem>>, vector<32x1xf32>
    %42 = vector.broadcast %41 : vector<32x1xf32> to vector<32x384xf32>
    %43 = arith.addf %40, %42 : vector<32x384xf32>
    %44 = arith.negf %43 : vector<32x384xf32>
    %45 = math.exp %44 : vector<32x384xf32>
    %cst_32 = arith.constant 1.000000e+00 : f32
    %46 = vector.broadcast %cst_32 : f32 to vector<32x384xf32>
    %47 = arith.addf %46, %45 : vector<32x384xf32>
    %48 = arith.divf %46, %47 : vector<32x384xf32>
    %49 = arith.mulf %43, %48 : vector<32x384xf32>
    %c0_33 = arith.constant 0 : index
    %c0_34 = arith.constant 0 : index
    %50 = vector.load %arg14[%c0_33, %c0_34] : memref<1x32xf32, #tpu.memory_space<vmem>>, vector<1x32xf32>
    %cst_35 = arith.constant dense<0.000000e+00> : vector<1x384xf32>
    %51 = tpu.matmul %50, %49, %cst_35 {dimension_numbers = #tpu.dot_dimension_numbers<[1], [0], [0], [1], [0, 0, 1, 1], [], []>} : vector<1x32xf32>, vector<32x384xf32>, vector<1x384xf32> -> vector<1x384xf32>
    %c0_36 = arith.constant 0 : index
    %c0_37 = arith.constant 0 : index
    %52 = vector.load %arg15[%c0_36, %c0_37] : memref<1x1xf32, #tpu.memory_space<vmem>>, vector<1x1xf32>
    %53 = vector.broadcast %52 : vector<1x1xf32> to vector<1x384xf32>
    %54 = arith.addf %51, %53 : vector<1x384xf32>
    %c0_38 = arith.constant 0 : index
    %c0_39 = arith.constant 0 : index
    %55 = vector.load %arg16[%c0_38, %c0_39] : memref<32x384xf32, #tpu.memory_space<vmem>>, vector<32x384xf32>
    tpu.vector_store %arg16[%c0_38, %c0_39], %38 {strides = array<i32>} : memref<32x384xf32, #tpu.memory_space<vmem>>, vector<32x384xf32>,
    %56 = vector.broadcast %54 : vector<1x384xf32> to vector<3x384xf32>
    %57 = arith.mulf %0, %56 : vector<3x384xf32>
    %c0_40 = arith.constant 0 : index
    %c0_41 = arith.constant 0 : index
    %58 = vector.load %arg17[%c0_40, %c0_41] : memref<3x384xf32, #tpu.memory_space<vmem>>, vector<3x384xf32>
    tpu.vector_store %arg17[%c0_40, %c0_41], %57 {strides = array<i32>} : memref<3x384xf32, #tpu.memory_space<vmem>>, vector<3x384xf32>,
    return
  }
  func.func @transform_0(%arg0: i32) -> (i32, i32) {
    %c0_i32 = arith.constant 0 : i32
    %c0_i32_0 = arith.constant 0 : i32
    return %c0_i32, %arg0 : i32, i32
  }
  func.func @transform_1(%arg0: i32) -> (i32, i32) {
    %c0_i32 = arith.constant 0 : i32
    %c0_i32_0 = arith.constant 0 : i32
    return %c0_i32, %arg0 : i32, i32
  }
  func.func @transform_2(%arg0: i32) -> (i32, i32) {
    %c0_i32 = arith.constant 0 : i32
    %c0_i32_0 = arith.constant 0 : i32
    return %c0_i32, %arg0 : i32, i32
  }
  func.func @transform_3(%arg0: i32) -> (i32, i32) {
    %c0_i32 = arith.constant 0 : i32
    %c0_i32_0 = arith.constant 0 : i32
    return %c0_i32, %arg0 : i32, i32
  }
  func.func @transform_4(%arg0: i32) -> (i32, i32) {
    %c0_i32 = arith.constant 0 : i32
    %c0_i32_0 = arith.constant 0 : i32
    %c0_i32_1 = arith.constant 0 : i32
    return %c0_i32, %c0_i32_0 : i32, i32
  }
  func.func @transform_5(%arg0: i32) -> (i32, i32) {
    %c0_i32 = arith.constant 0 : i32
    %c0_i32_0 = arith.constant 0 : i32
    %c0_i32_1 = arith.constant 0 : i32
    return %c0_i32, %c0_i32_0 : i32, i32
  }
  func.func @transform_6(%arg0: i32) -> (i32, i32) {
    %c0_i32 = arith.constant 0 : i32
    %c0_i32_0 = arith.constant 0 : i32
    %c0_i32_1 = arith.constant 0 : i32
    return %c0_i32, %c0_i32_0 : i32, i32
  }
  func.func @transform_7(%arg0: i32) -> (i32, i32) {
    %c0_i32 = arith.constant 0 : i32
    %c0_i32_0 = arith.constant 0 : i32
    %c0_i32_1 = arith.constant 0 : i32
    return %c0_i32, %c0_i32_0 : i32, i32
  }
  func.func @transform_8(%arg0: i32) -> (i32, i32) {
    %c0_i32 = arith.constant 0 : i32
    %c0_i32_0 = arith.constant 0 : i32
    %c0_i32_1 = arith.constant 0 : i32
    return %c0_i32, %c0_i32_0 : i32, i32
  }
  func.func @transform_9(%arg0: i32) -> (i32, i32) {
    %c0_i32 = arith.constant 0 : i32
    %c0_i32_0 = arith.constant 0 : i32
    %c0_i32_1 = arith.constant 0 : i32
    return %c0_i32, %c0_i32_0 : i32, i32
  }
  func.func @transform_10(%arg0: i32) -> (i32, i32) {
    %c0_i32 = arith.constant 0 : i32
    %c0_i32_0 = arith.constant 0 : i32
    %c0_i32_1 = arith.constant 0 : i32
    return %c0_i32, %c0_i32_0 : i32, i32
  }
  func.func @transform_11(%arg0: i32) -> (i32, i32) {
    %c0_i32 = arith.constant 0 : i32
    %c0_i32_0 = arith.constant 0 : i32
    %c0_i32_1 = arith.constant 0 : i32
    return %c0_i32, %c0_i32_0 : i32, i32
  }
  func.func @transform_12(%arg0: i32) -> (i32, i32) {
    %c0_i32 = arith.constant 0 : i32
    %c0_i32_0 = arith.constant 0 : i32
    %c0_i32_1 = arith.constant 0 : i32
    return %c0_i32, %c0_i32_0 : i32, i32
  }
  func.func @transform_13(%arg0: i32) -> (i32, i32) {
    %c0_i32 = arith.constant 0 : i32
    %c0_i32_0 = arith.constant 0 : i32
    %c0_i32_1 = arith.constant 0 : i32
    return %c0_i32, %c0_i32_0 : i32, i32
  }
  func.func @transform_14(%arg0: i32) -> (i32, i32) {
    %c0_i32 = arith.constant 0 : i32
    %c0_i32_0 = arith.constant 0 : i32
    %c0_i32_1 = arith.constant 0 : i32
    return %c0_i32, %c0_i32_0 : i32, i32
  }
  func.func @transform_15(%arg0: i32) -> (i32, i32) {
    %c0_i32 = arith.constant 0 : i32
    %c0_i32_0 = arith.constant 0 : i32
    return %c0_i32, %arg0 : i32, i32
  }
  func.func @transform_16(%arg0: i32) -> (i32, i32) {
    %c0_i32 = arith.constant 0 : i32
    %c0_i32_0 = arith.constant 0 : i32
    return %c0_i32, %arg0 : i32, i32
  }
}

module attributes {stable_mosaic.version = 11 : i64} {
  func.func @_node_h_kernel(%arg0: i32, %arg1: memref<32x128xf32, #tpu.memory_space<vmem>>, %arg2: memref<32x128xf32, #tpu.memory_space<vmem>>, %arg3: memref<32x32xf32, #tpu.memory_space<vmem>>, %arg4: memref<32x32xf32, #tpu.memory_space<vmem>>, %arg5: memref<32x1xf32, #tpu.memory_space<vmem>>, %arg6: memref<32x32xf32, #tpu.memory_space<vmem>>, %arg7: memref<32x1xf32, #tpu.memory_space<vmem>>, %arg8: memref<32x128xf32, #tpu.memory_space<vmem>>) attributes {dimension_semantics = [#tpu.dimension_semantics<parallel>], iteration_bounds = array<i64: 1>, scalar_prefetch = 0 : i64, scratch_operands = 0 : i64, tpu.core_type = #tpu.core_type<tc>, window_params = [{transform_indices = @transform_0, window_bounds = array<i64: 32, 128>}, {transform_indices = @transform_1, window_bounds = array<i64: 32, 128>}, {pipeline_mode = #tpu.pipeline_mode<synchronous>, transform_indices = @transform_2, window_bounds = array<i64: 32, 32>}, {pipeline_mode = #tpu.pipeline_mode<synchronous>, transform_indices = @transform_3, window_bounds = array<i64: 32, 32>}, {pipeline_mode = #tpu.pipeline_mode<synchronous>, transform_indices = @transform_4, window_bounds = array<i64: 32, 1>}, {pipeline_mode = #tpu.pipeline_mode<synchronous>, transform_indices = @transform_5, window_bounds = array<i64: 32, 32>}, {pipeline_mode = #tpu.pipeline_mode<synchronous>, transform_indices = @transform_6, window_bounds = array<i64: 32, 1>}, {transform_indices = @transform_7, window_bounds = array<i64: 32, 128>}]} {
    %c0 = arith.constant 0 : index
    %c0_0 = arith.constant 0 : index
    %0 = vector.load %arg1[%c0, %c0_0] : memref<32x128xf32, #tpu.memory_space<vmem>>, vector<32x128xf32>
    %c0_1 = arith.constant 0 : index
    %c0_2 = arith.constant 0 : index
    %1 = vector.load %arg3[%c0_1, %c0_2] : memref<32x32xf32, #tpu.memory_space<vmem>>, vector<32x32xf32>
    %cst = arith.constant dense<0.000000e+00> : vector<32x128xf32>
    %2 = tpu.matmul %1, %0, %cst {dimension_numbers = #tpu.dot_dimension_numbers<[1], [0], [0], [1], [0, 0, 1, 1], [], []>} : vector<32x32xf32>, vector<32x128xf32>, vector<32x128xf32> -> vector<32x128xf32>
    %c0_3 = arith.constant 0 : index
    %c0_4 = arith.constant 0 : index
    %3 = vector.load %arg4[%c0_3, %c0_4] : memref<32x32xf32, #tpu.memory_space<vmem>>, vector<32x32xf32>
    %c0_5 = arith.constant 0 : index
    %c0_6 = arith.constant 0 : index
    %4 = vector.load %arg2[%c0_5, %c0_6] : memref<32x128xf32, #tpu.memory_space<vmem>>, vector<32x128xf32>
    %cst_7 = arith.constant dense<0.000000e+00> : vector<32x128xf32>
    %5 = tpu.matmul %3, %4, %cst_7 {dimension_numbers = #tpu.dot_dimension_numbers<[1], [0], [0], [1], [0, 0, 1, 1], [], []>} : vector<32x32xf32>, vector<32x128xf32>, vector<32x128xf32> -> vector<32x128xf32>
    %6 = arith.addf %2, %5 : vector<32x128xf32>
    %c0_8 = arith.constant 0 : index
    %c0_9 = arith.constant 0 : index
    %7 = vector.load %arg5[%c0_8, %c0_9] : memref<32x1xf32, #tpu.memory_space<vmem>>, vector<32x1xf32>
    %8 = vector.broadcast %7 : vector<32x1xf32> to vector<32x128xf32>
    %9 = arith.addf %6, %8 : vector<32x128xf32>
    %10 = arith.negf %9 : vector<32x128xf32>
    %11 = math.exp %10 : vector<32x128xf32>
    %cst_10 = arith.constant 1.000000e+00 : f32
    %12 = vector.broadcast %cst_10 : f32 to vector<32x128xf32>
    %13 = arith.addf %12, %11 : vector<32x128xf32>
    %14 = arith.divf %12, %13 : vector<32x128xf32>
    %15 = arith.mulf %9, %14 : vector<32x128xf32>
    %c0_11 = arith.constant 0 : index
    %c0_12 = arith.constant 0 : index
    %16 = vector.load %arg6[%c0_11, %c0_12] : memref<32x32xf32, #tpu.memory_space<vmem>>, vector<32x32xf32>
    %cst_13 = arith.constant dense<0.000000e+00> : vector<32x128xf32>
    %17 = tpu.matmul %16, %15, %cst_13 {dimension_numbers = #tpu.dot_dimension_numbers<[1], [0], [0], [1], [0, 0, 1, 1], [], []>} : vector<32x32xf32>, vector<32x128xf32>, vector<32x128xf32> -> vector<32x128xf32>
    %c0_14 = arith.constant 0 : index
    %c0_15 = arith.constant 0 : index
    %18 = vector.load %arg7[%c0_14, %c0_15] : memref<32x1xf32, #tpu.memory_space<vmem>>, vector<32x1xf32>
    %19 = vector.broadcast %18 : vector<32x1xf32> to vector<32x128xf32>
    %20 = arith.addf %17, %19 : vector<32x128xf32>
    %21 = arith.addf %0, %20 : vector<32x128xf32>
    %c0_16 = arith.constant 0 : index
    %c0_17 = arith.constant 0 : index
    %22 = vector.load %arg8[%c0_16, %c0_17] : memref<32x128xf32, #tpu.memory_space<vmem>>, vector<32x128xf32>
    tpu.vector_store %arg8[%c0_16, %c0_17], %21 {strides = array<i32>} : memref<32x128xf32, #tpu.memory_space<vmem>>, vector<32x128xf32>,
    return
  }
  func.func @transform_0(%arg0: i32) -> (i32, i32) {
    %c0_i32 = arith.constant 0 : i32
    %c0_i32_0 = arith.constant 0 : i32
    return %c0_i32, %arg0 : i32, i32
  }
  func.func @transform_1(%arg0: i32) -> (i32, i32) {
    %c0_i32 = arith.constant 0 : i32
    %c0_i32_0 = arith.constant 0 : i32
    return %c0_i32, %arg0 : i32, i32
  }
  func.func @transform_2(%arg0: i32) -> (i32, i32) {
    %c0_i32 = arith.constant 0 : i32
    %c0_i32_0 = arith.constant 0 : i32
    %c0_i32_1 = arith.constant 0 : i32
    return %c0_i32, %c0_i32_0 : i32, i32
  }
  func.func @transform_3(%arg0: i32) -> (i32, i32) {
    %c0_i32 = arith.constant 0 : i32
    %c0_i32_0 = arith.constant 0 : i32
    %c0_i32_1 = arith.constant 0 : i32
    return %c0_i32, %c0_i32_0 : i32, i32
  }
  func.func @transform_4(%arg0: i32) -> (i32, i32) {
    %c0_i32 = arith.constant 0 : i32
    %c0_i32_0 = arith.constant 0 : i32
    %c0_i32_1 = arith.constant 0 : i32
    return %c0_i32, %c0_i32_0 : i32, i32
  }
  func.func @transform_5(%arg0: i32) -> (i32, i32) {
    %c0_i32 = arith.constant 0 : i32
    %c0_i32_0 = arith.constant 0 : i32
    %c0_i32_1 = arith.constant 0 : i32
    return %c0_i32, %c0_i32_0 : i32, i32
  }
  func.func @transform_6(%arg0: i32) -> (i32, i32) {
    %c0_i32 = arith.constant 0 : i32
    %c0_i32_0 = arith.constant 0 : i32
    %c0_i32_1 = arith.constant 0 : i32
    return %c0_i32, %c0_i32_0 : i32, i32
  }
  func.func @transform_7(%arg0: i32) -> (i32, i32) {
    %c0_i32 = arith.constant 0 : i32
    %c0_i32_0 = arith.constant 0 : i32
    return %c0_i32, %arg0 : i32, i32
  }
}

module attributes {stable_mosaic.version = 11 : i64} {
  func.func @_node_v_kernel(%arg0: i32, %arg1: memref<32x128xf32, #tpu.memory_space<vmem>>, %arg2: memref<32x32xf32, #tpu.memory_space<vmem>>, %arg3: memref<32x1xf32, #tpu.memory_space<vmem>>, %arg4: memref<1x32xf32, #tpu.memory_space<vmem>>, %arg5: memref<1x1xf32, #tpu.memory_space<vmem>>, %arg6: memref<1x128xf32, #tpu.memory_space<vmem>>) attributes {dimension_semantics = [#tpu.dimension_semantics<parallel>], iteration_bounds = array<i64: 1>, scalar_prefetch = 0 : i64, scratch_operands = 0 : i64, tpu.core_type = #tpu.core_type<tc>, window_params = [{transform_indices = @transform_0, window_bounds = array<i64: 32, 128>}, {pipeline_mode = #tpu.pipeline_mode<synchronous>, transform_indices = @transform_1, window_bounds = array<i64: 32, 32>}, {pipeline_mode = #tpu.pipeline_mode<synchronous>, transform_indices = @transform_2, window_bounds = array<i64: 32, 1>}, {pipeline_mode = #tpu.pipeline_mode<synchronous>, transform_indices = @transform_3, window_bounds = array<i64: 1, 32>}, {pipeline_mode = #tpu.pipeline_mode<synchronous>, transform_indices = @transform_4, window_bounds = array<i64: 1, 1>}, {transform_indices = @transform_5, window_bounds = array<i64: 1, 128>}]} {
    %c0 = arith.constant 0 : index
    %c0_0 = arith.constant 0 : index
    %0 = vector.load %arg2[%c0, %c0_0] : memref<32x32xf32, #tpu.memory_space<vmem>>, vector<32x32xf32>
    %c0_1 = arith.constant 0 : index
    %c0_2 = arith.constant 0 : index
    %1 = vector.load %arg1[%c0_1, %c0_2] : memref<32x128xf32, #tpu.memory_space<vmem>>, vector<32x128xf32>
    %cst = arith.constant dense<0.000000e+00> : vector<32x128xf32>
    %2 = tpu.matmul %0, %1, %cst {dimension_numbers = #tpu.dot_dimension_numbers<[1], [0], [0], [1], [0, 0, 1, 1], [], []>} : vector<32x32xf32>, vector<32x128xf32>, vector<32x128xf32> -> vector<32x128xf32>
    %c0_3 = arith.constant 0 : index
    %c0_4 = arith.constant 0 : index
    %3 = vector.load %arg3[%c0_3, %c0_4] : memref<32x1xf32, #tpu.memory_space<vmem>>, vector<32x1xf32>
    %4 = vector.broadcast %3 : vector<32x1xf32> to vector<32x128xf32>
    %5 = arith.addf %2, %4 : vector<32x128xf32>
    %6 = arith.negf %5 : vector<32x128xf32>
    %7 = math.exp %6 : vector<32x128xf32>
    %cst_5 = arith.constant 1.000000e+00 : f32
    %8 = vector.broadcast %cst_5 : f32 to vector<32x128xf32>
    %9 = arith.addf %8, %7 : vector<32x128xf32>
    %10 = arith.divf %8, %9 : vector<32x128xf32>
    %11 = arith.mulf %5, %10 : vector<32x128xf32>
    %c0_6 = arith.constant 0 : index
    %c0_7 = arith.constant 0 : index
    %12 = vector.load %arg4[%c0_6, %c0_7] : memref<1x32xf32, #tpu.memory_space<vmem>>, vector<1x32xf32>
    %cst_8 = arith.constant dense<0.000000e+00> : vector<1x128xf32>
    %13 = tpu.matmul %12, %11, %cst_8 {dimension_numbers = #tpu.dot_dimension_numbers<[1], [0], [0], [1], [0, 0, 1, 1], [], []>} : vector<1x32xf32>, vector<32x128xf32>, vector<1x128xf32> -> vector<1x128xf32>
    %c0_9 = arith.constant 0 : index
    %c0_10 = arith.constant 0 : index
    %14 = vector.load %arg5[%c0_9, %c0_10] : memref<1x1xf32, #tpu.memory_space<vmem>>, vector<1x1xf32>
    %15 = vector.broadcast %14 : vector<1x1xf32> to vector<1x128xf32>
    %16 = arith.addf %13, %15 : vector<1x128xf32>
    %c0_11 = arith.constant 0 : index
    %c0_12 = arith.constant 0 : index
    %17 = vector.load %arg6[%c0_11, %c0_12] : memref<1x128xf32, #tpu.memory_space<vmem>>, vector<1x128xf32>
    tpu.vector_store %arg6[%c0_11, %c0_12], %16 {strides = array<i32>} : memref<1x128xf32, #tpu.memory_space<vmem>>, vector<1x128xf32>,
    return
  }
  func.func @transform_0(%arg0: i32) -> (i32, i32) {
    %c0_i32 = arith.constant 0 : i32
    %c0_i32_0 = arith.constant 0 : i32
    return %c0_i32, %arg0 : i32, i32
  }
  func.func @transform_1(%arg0: i32) -> (i32, i32) {
    %c0_i32 = arith.constant 0 : i32
    %c0_i32_0 = arith.constant 0 : i32
    %c0_i32_1 = arith.constant 0 : i32
    return %c0_i32, %c0_i32_0 : i32, i32
  }
  func.func @transform_2(%arg0: i32) -> (i32, i32) {
    %c0_i32 = arith.constant 0 : i32
    %c0_i32_0 = arith.constant 0 : i32
    %c0_i32_1 = arith.constant 0 : i32
    return %c0_i32, %c0_i32_0 : i32, i32
  }
  func.func @transform_3(%arg0: i32) -> (i32, i32) {
    %c0_i32 = arith.constant 0 : i32
    %c0_i32_0 = arith.constant 0 : i32
    %c0_i32_1 = arith.constant 0 : i32
    return %c0_i32, %c0_i32_0 : i32, i32
  }
  func.func @transform_4(%arg0: i32) -> (i32, i32) {
    %c0_i32 = arith.constant 0 : i32
    %c0_i32_0 = arith.constant 0 : i32
    %c0_i32_1 = arith.constant 0 : i32
    return %c0_i32, %c0_i32_0 : i32, i32
  }
  func.func @transform_5(%arg0: i32) -> (i32, i32) {
    %c0_i32 = arith.constant 0 : i32
    %c0_i32_0 = arith.constant 0 : i32
    return %c0_i32, %arg0 : i32, i32
  }
}

</mosaic_0001>

<bundles_post_ra>
// kernel: egnn_layer_forward.5
= control target key start
LH: loop header
LB: loop body
LE: loop exit
PB: predicated region body
PF: predicated region fallthrough
CT: control target
= control target key end

     0   :  { %v406_v5 = vmov 0   ;;  %vm43_vm0 = vcmask 261120   ;;  %s639_s0 = inlined_call_operand.vmem [shape: f32[32,128], index: 0, kind: input, shape index: {}]   ;;  %s640_s1 = inlined_call_operand.vmem [shape: f32[32,128], index: 1, kind: input, shape index: {}]   ;;  %s641_s2 = inlined_call_operand.vmem [shape: f32[32,32], index: 2, kind: input, shape index: {}]   ;;  %s642_s3 = inlined_call_operand.vmem [shape: f32[32,32], index: 3, kind: input, shape index: {}]   ;;  %s643_s4 = inlined_call_operand.vmem [shape: f32[32,1], index: 4, kind: input, shape index: {}]   ;;  %s644_s5 = inlined_call_operand.vmem [shape: f32[32,32], index: 5, kind: input, shape index: {}]   ;;  %s645_s6 = inlined_call_operand.vmem [shape: f32[32,1], index: 6, kind: input, shape index: {}]   ;;  %s646_s7 = inlined_call_operand.hbm [shape: f32[32,128], index: 7, kind: output, shape index: {}]  }
   0x1   :  { %v42_v0 = vld [vmem:[%s640_s1 + $0x18] sm:$0xff]  ;;  %v41_v1 = vld [vmem:[%s640_s1 + $0x10] sm:$0xff]  ;;  %v40_v3 = vld [vmem:[%s640_s1 + $0x8] sm:$0xff]  ;;  %362 = vset.pattern.permute.xlu1 %v406_v5  ;;  %361 = vset.pattern.permute.xlu0 %v406_v5 }
   0x2   :  { %68 = vmatpush.msra.mxu0 %v42_v0  ;;  %345 = vmatpush.msra.mxu3 %v42_v0  ;;  %v459_v2 = vld [vmem:[%s639_s0 + $0x18] sm:$0xff]  ;;  %v468_v4 = vld [vmem:[%s639_s0 + $0x10] sm:$0xff]  ;;  %v473_v6 = vld [vmem:[%s639_s0 + $0x8] sm:$0xff] }
   0x3   :  { %349 = vmatpush.msra.mxu1 %v459_v2  ;;  %v39_v7 = vld [vmem:[%s640_s1] sm:$0xff]  ;;  %v129_v8 = vld [vmem:[%s643_s4 + $0x18] sm:$0xff]  ;;  %v36_v10 = vld [vmem:[%s642_s3 + $0x8] sm:$0xff] }
   0x4   :  { %69 = vmatpush.msra.mxu0 %v41_v1  ;;  %346 = vmatpush.msra.mxu3 %v41_v1  ;;  %v35_v9 = vld [vmem:[%s642_s3] sm:$0xff]  ;;  %v32_v12 = vld [vmem:[%s641_s2 + $0x8] sm:$0xff] }
   0x5   :  { %350 = vmatpush.msra.mxu1 %v468_v4  ;;  %v492_v11 = vld [vmem:[%s639_s0] sm:$0xff]  ;;  %147 = vperm.xlu0 %361, %v129_v8   ;;  %v127_v13 = vld [vmem:[%s643_s4 + $0x8] sm:$0xff] }
   0x6   :  { %70 = vmatpush.msra.mxu0 %v40_v3  ;;  %347 = vmatpush.msra.mxu3 %v40_v3 }
   0x7   :  { %351 = vmatpush.msra.mxu1 %v473_v6 }
   0x8   :  { %71 = vmatpush.msra.mxu0 %v39_v7  ;;  %348 = vmatpush.msra.mxu3 %v39_v7 }
   0x9   :  { %12 = vsyncpa [#allocation3], 0  ;;  %329 = vmatmul.msk.f32.vlgmr.msra.gmra.mxu0 %vm43_vm0, %v35_v9  ;;  %330 = vmatmul.msk.f32.vlgmr.msra.gmra.mxu3 %vm43_vm0, %v36_v10  ;;  %v128_v14 = vld [vmem:[%s643_s4 + $0x10] sm:$0xff]  ;;  %v31_v16 = vld [vmem:[%s641_s2] sm:$0xff]  ;;  %s317_s29 = sshll.u32 %s646_s7, 4  ;;  %s408_s30 = smov 128   ;;  %s318_s29 = int_to_ptr.hbm [resolvable:$true] %s317_s29 }
   0xa   :  { %109 = vmatpush.msrb.mxu0 %v459_v2  ;;  %352 = vmatpush.msra.mxu1 %v492_v11  ;;  %v37_v15 = vld [vmem:[%s642_s3 + $0x10] sm:$0xff]  ;;  %v126_v18 = vld [vmem:[%s643_s4] sm:$0xff]  ;;  %v38_v20 = vld [vmem:[%s642_s3 + $0x18] sm:$0xff]  ;;  %s409_s8 = smov 8  }
   0xb   :  { %334 = vmatmul.msk.f32.vlgmr.msra.gmra.mxu1 %vm43_vm0, %v32_v12  ;;  %137 = vperm.xlu1 %362, %v127_v13   ;;  %v33_v17 = vld [vmem:[%s641_s2 + $0x10] sm:$0xff]  ;;  %v34_v21 = vld [vmem:[%s641_s2 + $0x18] sm:$0xff] }
   0xc   :  { %110 = vmatpush.msrb.mxu0 %v468_v4  ;;  %363 = vset.pattern.permute.xlu2 %v406_v5  ;;  %v240_v19 = vld [vmem:[%s645_s6 + $0x10] sm:$0xff]  ;;  %v241_v22 = vld [vmem:[%s645_s6 + $0x18] sm:$0xff] }
   0xd   :  { %142 = vperm.xlu0 %361, %v128_v14   ;;  %v238_v14 = vld [vmem:[%s645_s6] sm:$0xff] }
   0xe   :  { %111 = vmatpush.msrb.mxu0 %v473_v6  ;;  %244 = vperm.xlu2 %363, %v238_v14  }
  0x10   :  { %112 = vmatpush.msrb.mxu0 %v492_v11 }
  0x11   :  { %331 = vmatmul.msk.f32.gmra.mxu3 %vm43_vm0, %v37_v15  ;;  %333 = vmatmul.msk.f32.vlgmr.msrb.gmra.mxu0 %vm43_vm0, %v31_v16 }
  0x13   :  { %335 = vmatmul.msk.f32.gmra.mxu1 %vm43_vm0, %v33_v17  ;;  %132 = vperm.xlu1 %362, %v126_v18  }
  0x15   :  { %254 = vperm.xlu0 %361, %v240_v19  }
  0x19   :  { %332 = vmatmul.msk.f32.gmra.mxu3 %vm43_vm0, %v38_v20 }
  0x1b   :  { %336 = vmatmul.msk.f32.gmra.mxu1 %vm43_vm0, %v34_v21  ;;  %259 = vperm.xlu1 %362, %v241_v22  }
  0x77   :  { %v148_v26 = vpop.permute.xlu0 %147 }
  0x7d   :  { %v138_v23 = vpop.permute.xlu1 %137 }
  0x7f   :  { %v143_v39 = vpop.permute.xlu0 %142 }
  0x85   :  { %v133_v30 = vpop.permute.xlu1 %132 }
  0x86   :  { %v73_v24 = vpop.f32.mrf.mxu0 }
  0x88   :  { %v117_v25 = vpop.f32.mrf.mxu1 }
  0x8c   :  { %v76_v27 = vpop.f32.mrf.mxu3 }
  0x8d   :  { %v118_v28 = vadd.f32 %v117_v25, %v76_v27 }
  0x8e   :  { %v114_v29 = vpop.f32.mrf.mxu0 }
  0x8f   :  { %v540_v31 = vadd.f32 %v138_v23, %v118_v28  ;;  %v115_v32 = vadd.f32 %v114_v29, %v73_v24 }
  0x90   :  { %v120_v33 = vpop.f32.mrf.mxu1 }
  0x91   :  { %v338_v34 = vmul.f32 -1.442695, %v540_v31  ;;  %v543_v35 = vadd.f32 %v133_v30, %v115_v32 }
  0x93   :  { %v337_v36 = vmul.f32 -1.442695, %v543_v35  ;;  %364 = vpow2.f32 %v338_v34 }
  0x94   :  { %v79_v37 = vpop.f32.mrf.mxu3 }
  0x95   :  { %366 = vpow2.f32 %v337_v36  ;;  %v121_v38 = vadd.f32 %v120_v33, %v79_v37 }
  0x97   :  { %v546_v40 = vadd.f32 %v143_v39, %v121_v38 }
  0x98   :  { %v123_v43 = vpop.f32.mrf.mxu1 }
  0x99   :  { %v339_v41 = vmul.f32 -1.442695, %v546_v40  ;;  %v365_v42 = vpop.eup %364 }
  0x9a   :  { %v549_v46 = vadd.f32 1.0, %v365_v42 }
  0x9b   :  { %v367_v44 = vpop.eup %366  ;;  %368 = vpow2.f32 %v339_v41  ;;  %v239_v41 = vld [vmem:[%s645_s6 + $0x8] sm:$0xff] }
  0x9c   :  { %v82_v45 = vpop.f32.mrf.mxu3  ;;  %v551_v48 = vadd.f32 1.0, %v367_v44  ;;  %370 = vrcp.f32 %v549_v46  ;;  %vm190_vm3 = vweird.f32 %v549_v46  ;;  %v194_v22 = vand.u32 2147483647, %v549_v46  ;;  %249 = vperm.xlu2 %363, %v239_v41  }
  0x9d   :  { %v124_v47 = vadd.f32 %v123_v43, %v82_v45  ;;  %v196_v23 = vand.u32 2147483648, %v549_v46 }
  0x9e   :  { %372 = vrcp.f32 %v551_v48  ;;  %vm175_vm1 = vweird.f32 %v551_v48  ;;  %v179_v19 = vand.u32 2147483647, %v551_v48  ;;  %v181_v20 = vand.u32 2147483648, %v551_v48 }
  0x9f   :  { %v553_v49 = vadd.f32 %v148_v26, %v124_v47  ;;  %v197_v37 = vor.u32 1.1754944e-38, %v196_v23  ;;  %v235_v47 = vld [vmem:[%s644_s5 + $0x8] sm:$0xff] }
  0xa0   :  { %v182_v33 = vor.u32 1.1754944e-38, %v181_v20  ;;  %vm180_vm15 = vcmp.eq.f32.partialorder %v179_v19, 8.507059e+37 }
  0xa1   :  { %v369_v50 = vpop.eup %368  ;;  %v340_v51 = vmul.f32 -1.442695, %v553_v49 }
  0xa2   :  { %v168_v52 = vadd.f32 1.0, %v369_v50  ;;  %v558_v53 = vpop.eup %370 }
  0xa3   :  { %374 = vpow2.f32 %v340_v51  ;;  %v186_v59 = vmul.f32 %v558_v53, %v549_v46  ;;  %vm191_vm4 = vweird.f32 %v558_v53 }
  0xa4   :  { %376 = vrcp.f32 %v168_v52  ;;  %v560_v54 = vpop.eup %372  ;;  %vm205_vm2 = vweird.f32 %v168_v52  ;;  %v209_v12 = vand.u32 2147483647, %v168_v52  ;;  %v211_v13 = vand.u32 2147483648, %v168_v52  ;;  %vm578_vm8 = vmor %vm190_vm3, %vm191_vm4 }
  0xa5   :  { %v171_v60 = vmul.f32 %v560_v54, %v551_v48  ;;  %v187_v62 = vsub.f32 1.0, %v186_v59  ;;  %vm176_vm6 = vweird.f32 %v560_v54  ;;  %v234_v48 = vld [vmem:[%s644_s5] sm:$0xff] }
  0xa6   :  { %vm596_vm10 = vmor %vm175_vm1, %vm176_vm6  ;;  %v212_v29 = vor.u32 1.1754944e-38, %v211_v13  ;;  %vm210_vm14 = vcmp.eq.f32.partialorder %v209_v12, 8.507059e+37  ;;  %vm195_vm1 = vcmp.eq.f32.partialorder %v194_v22, 8.507059e+37 }
  0xa7   :  { %v172_v63 = vsub.f32 1.0, %v171_v60  ;;  %v188_v5 = vmul.f32 %v558_v53, %v187_v62 }
  0xa9   :  { %v375_v55 = vpop.eup %374  ;;  %v173_v7 = vmul.f32 %v560_v54, %v172_v63  ;;  %v189_v17 = vadd.f32 %v558_v53, %v188_v5 }
  0xaa   :  { %v377_v56 = vpop.eup %376  ;;  %v169_v57 = vadd.f32 1.0, %v375_v55 }
  0xab   :  { %v201_v58 = vmul.f32 %v377_v56, %v168_v52  ;;  %vm206_vm5 = vweird.f32 %v377_v56  ;;  %v174_v24 = vadd.f32 %v560_v54, %v173_v7  ;;  %v193_v32 = vsel %vm578_vm8, %v558_v53, %v189_v17 }
  0xac   :  { %378 = vrcp.f32 %v169_v57  ;;  %v226_v10 = vand.u32 2147483648, %v169_v57  ;;  %v224_v16 = vand.u32 2147483647, %v169_v57  ;;  %vm585_vm9 = vmor %vm205_vm2, %vm206_vm5  ;;  %vm220_vm11 = vweird.f32 %v169_v57 }
  0xad   :  { %v202_v61 = vsub.f32 1.0, %v201_v58  ;;  %v178_v38 = vsel %vm596_vm10, %v560_v54, %v174_v24  ;;  %v198_v42 = vsel %vm195_vm1, %v197_v37, %v193_v32 }
  0xae   :  { %v227_v28 = vor.u32 1.1754944e-38, %v226_v10  ;;  %vm225_vm13 = vcmp.eq.f32.partialorder %v224_v16, 8.507059e+37  ;;  %v183_v44 = vsel %vm180_vm15, %v182_v33, %v178_v38  ;;  %v231_v45 = vmul.f32 %v198_v42, %v540_v31  ;;  %v236_v31 = vld [vmem:[%s644_s5 + $0x10] sm:$0xff] }
  0xaf   :  { %v203_v0 = vmul.f32 %v377_v56, %v202_v61  ;;  %v230_v46 = vmul.f32 %v183_v44, %v543_v35  ;;  %v237_v35 = vld [vmem:[%s644_s5 + $0x18] sm:$0xff]  ;;  %s407_s5 = smov [#allocation2]  }
  0xb0   :  { %s315_s26 = sshll.u32 %s407_s5, 4  ;;  %s316_s26 = int_to_ptr.vmem [resolvable:$true] %s315_s26 }
  0xb1   :  { %v204_v9 = vadd.f32 %v377_v56, %v203_v0 }
  0xb2   :  { %v379_v1 = vpop.eup %378 }
  0xb3   :  { %v216_v3 = vmul.f32 %v379_v1, %v169_v57  ;;  %vm221_vm7 = vweird.f32 %v379_v1  ;;  %v208_v27 = vsel %vm585_vm9, %v377_v56, %v204_v9  ;;  %v255_v56 = vpop.permute.xlu0 %254 }
  0xb4   :  { %vm222_vm12 = vmor %vm220_vm11, %vm221_vm7  ;;  %v213_v36 = vsel %vm210_vm14, %v212_v29, %v208_v27 }
  0xb5   :  { %v217_v8 = vsub.f32 1.0, %v216_v3  ;;  %v232_v43 = vmul.f32 %v213_v36, %v546_v40  ;;  %v245_v40 = vpop.permute.xlu2 %244 }
  0xb7   :  { %v218_v15 = vmul.f32 %v379_v1, %v217_v8 }
  0xb9   :  { %v219_v26 = vadd.f32 %v379_v1, %v218_v15 }
  0xbb   :  { %v223_v30 = vsel %vm222_vm12, %v379_v1, %v219_v26 }
  0xbc   :  { %v228_v34 = vsel %vm225_vm13, %v227_v28, %v223_v30 }
  0xbd   :  { %v233_v39 = vmul.f32 %v228_v34, %v553_v49 }
  0xbf   :  { %286 = vmatpush.msra.mxu0 %v233_v39  ;;  %353 = vmatpush.msra.mxu2 %v233_v39 }
  0xc1   :  { %287 = vmatpush.msra.mxu0 %v232_v43  ;;  %354 = vmatpush.msra.mxu2 %v232_v43 }
  0xc3   :  { %288 = vmatpush.msra.mxu0 %v231_v45  ;;  %355 = vmatpush.msra.mxu2 %v231_v45 }
  0xc5   :  { %289 = vmatpush.msra.mxu0 %v230_v46  ;;  %356 = vmatpush.msra.mxu2 %v230_v46 }
  0xc6   :  { %342 = vmatmul.msk.f32.vlgmr.msra.gmra.mxu2 %vm43_vm0, %v235_v47  ;;  %341 = vmatmul.msk.f32.vlgmr.msra.gmra.mxu0 %vm43_vm0, %v234_v48 }
  0xce   :  { %343 = vmatmul.msk.f32.gmra.mxu2 %vm43_vm0, %v236_v31 }
  0xd6   :  { %344 = vmatmul.msk.f32.gmra.mxu2 %vm43_vm0, %v237_v35 }
  0xf6   :  { %v250_v52 = vpop.permute.xlu2 %249 }
 0x143   :  { %v291_v49 = vpop.f32.mrf.mxu0 }
 0x144   :  { %v292_v50 = vadd.f32 %v291_v49, %v245_v40 }
 0x146   :  { %v303_v51 = vadd.f32 %v292_v50, %v492_v11  ;;  %v260_v11 = vpop.permute.xlu1 %259 }
 0x148   :  { %307 = vst [vmem:[#allocation2] sm:$0xff] %v303_v51 }
 0x149   :  { %v294_v53 = vpop.f32.mrf.mxu2 }
 0x14a   :  { %v295_v54 = vadd.f32 %v294_v53, %v250_v52 }
 0x14c   :  { %v304_v55 = vadd.f32 %v295_v54, %v473_v6 }
 0x14e   :  { %308 = vst [vmem:[#allocation2 + $0x8] sm:$0xff] %v304_v55 }
 0x151   :  { %v297_v57 = vpop.f32.mrf.mxu2 }
 0x152   :  { %v298_v58 = vadd.f32 %v297_v57, %v255_v56 }
 0x154   :  { %v305_v59 = vadd.f32 %v298_v58, %v468_v4 }
 0x156   :  { %309 = vst [vmem:[#allocation2 + $0x10] sm:$0xff] %v305_v59 }
 0x159   :  { %v300_v60 = vpop.f32.mrf.mxu2 }
 0x15a   :  { %v301_v61 = vadd.f32 %v300_v60, %v260_v11 }
 0x15c   :  { %v306_v6 = vadd.f32 %v301_v61, %v459_v2 }
 0x15e   :  { %310 = vst [vmem:[#allocation2 + $0x18] sm:$0xff] %v306_v6 }
 0x15f   :  { %323 = dma.vmem_to_hbm [thread:$0]  %s316_s26, 512, %s318_s29, [#allocation3], %s408_s30, %s408_s30, %s409_s8  }
 0x160   :  { %404 = dma.done.wait [#allocation3], 512  }
 0x161   :  { %405 = vsyncadd [#allocation3], 4294966784 }
 0x162   :  { %328 = vsyncpa [#allocation3], 1 }

// kernel: egnn_layer_forward.3
= control target key start
LH: loop header
LB: loop body
LE: loop exit
PB: predicated region body
PF: predicated region fallthrough
CT: control target
= control target key end

     0   :  { %vm2773_vm0 = vcmask 261120   ;;  %v1597_v28 = vmov 0   ;;  %vm368_vm1 = vcmask 64512   ;;  %vm69_vm2 = vcmask 1042432   ;;  %s2755_s2 = inlined_call_operand.vmem [shape: f32[32,384], index: 2, kind: input, shape index: {}]   ;;  %s2756_s1 = inlined_call_operand.vmem [shape: f32[32,384], index: 1, kind: input, shape index: {}]   ;;  %s2757_s6 = inlined_call_operand.vmem [shape: f32[32,32], index: 6, kind: input, shape index: {}]   ;;  %s2758_s5 = inlined_call_operand.vmem [shape: f32[32,32], index: 5, kind: input, shape index: {}]   ;;  %s2759_s3 = inlined_call_operand.vmem [shape: f32[8,384], index: 3, kind: input, shape index: {}]   ;;  %s2760_s4 = inlined_call_operand.vmem [shape: f32[32,1], index: 4, kind: input, shape index: {}]   ;;  %s2761_s8 = inlined_call_operand.vmem [shape: f32[32,1], index: 8, kind: input, shape index: {}]   ;;  %s2762_s7 = inlined_call_operand.vmem [shape: f32[32,8], index: 7, kind: input, shape index: {}]   ;;  %s2763_s10 = inlined_call_operand.vmem [shape: f32[32,1], index: 10, kind: input, shape index: {}]   ;;  %s2764_s12 = inlined_call_operand.vmem [shape: f32[32,1], index: 12, kind: input, shape index: {}]   ;;  %s2765_s14 = inlined_call_operand.<no memory space> [shape: f32[1,1], index: 14, kind: input, shape index: {}]   ;;  %s2766_s0 = inlined_call_operand.vmem [shape: f32[3,384], index: 0, kind: input, shape index: {}]   ;;  %s2767_s9 = inlined_call_operand.vmem [shape: f32[32,32], index: 9, kind: input, shape index: {}]   ;;  %s2768_s15 = inlined_call_operand.vmem [shape: f32[32,384], index: 15, kind: output, shape index: {0}]   ;;  %s2769_s11 = inlined_call_operand.vmem [shape: f32[32,32], index: 11, kind: input, shape index: {}]   ;;  %s2770_s13 = inlined_call_operand.vmem [shape: f32[1,32], index: 13, kind: input, shape index: {}]   ;;  %s2771_s16 = inlined_call_operand.vmem [shape: f32[3,384], index: 16, kind: output, shape index: {1}]  }
   0x1   :  { %2774 = sst [smem:[#allocation3_spill]] %s2755_s2  ;;  %v143_v3 = vld [vmem:[%s2756_s1 + $0x48] sm:$0xff]  ;;  %v140_v7 = vld [vmem:[%s2756_s1 + $0x30] sm:$0xff]  ;;  %v137_v11 = vld [vmem:[%s2756_s1 + $0x18] sm:$0xff]  ;;  %1491 = vset.pattern.permute.xlu1 %v1597_v28  ;;  %1490 = vset.pattern.permute.xlu0 %v1597_v28  ;;  %v22_v51 = vstv %s2765_s14 }
   0x2   :  { %s2775_s23 = sld [smem:[#allocation3_spill]]  ;;  %286 = vmatpush.msra.mxu3 %v143_v3  ;;  %v134_v15 = vld [vmem:[%s2756_s1] sm:$0xff]  ;;  %v144_v18 = vld [vmem:[%s2756_s1 + $0x50] sm:$0xff]  ;;  %v145_v19 = vld [vmem:[%s2756_s1 + $0x58] sm:$0xff]  ;;  %1492 = vset.pattern.permute.xlu2 %v1597_v28  ;;  %23 = vst [vmem:[#allocation2] sm:$0x1] %v22_v51 }
   0x3   :  { %v146_v16 = vld [vmem:[%s2757_s6] sm:$0xff]  ;;  %v141_v20 = vld [vmem:[%s2756_s1 + $0x38] sm:$0xff]  ;;  %v366_v23 = vld [vmem:[%s2759_s3 + $0x8] sm:$0xff] }
   0x4   :  { %287 = vmatpush.msra.mxu3 %v140_v7  ;;  %v1737_v17 = vld [vmem:[%s2758_s5] sm:$0xff]  ;;  %v139_v25 = vld [vmem:[%s2756_s1 + $0x28] sm:$0xff]  ;;  %v136_v31 = vld [vmem:[%s2756_s1 + $0x10] sm:$0xff] }
   0x5   :  { %v142_v21 = vld [vmem:[%s2756_s1 + $0x40] sm:$0xff]  ;;  %v481_v26 = vld [vmem:[%s2760_s4 + $0x8] sm:$0xff]  ;;  %v483_v32 = vld [vmem:[%s2760_s4 + $0x18] sm:$0xff] }
   0x6   :  { %288 = vmatpush.msra.mxu3 %v137_v11  ;;  %v365_v22 = vld [vmem:[%s2759_s3] sm:$0xff]  ;;  %v147_v27 = vld [vmem:[%s2757_s6 + $0x8] sm:$0xff]  ;;  %491 = vperm.xlu1 %1491, %v481_v26   ;;  %v531_v33 = vld [vmem:[%s2761_s8 + $0x18] sm:$0xff] }
   0x7   :  { %v138_v24 = vld [vmem:[%s2756_s1 + $0x20] sm:$0xff]  ;;  %v131_v29 = vld [vmem:[%s2758_s5 + $0x8] sm:$0xff]  ;;  %501 = vperm.xlu0 %1490, %v483_v32   ;;  %v148_v34 = vld [vmem:[%s2757_s6 + $0x10] sm:$0xff] }
   0x8   :  { %v159_v0 = vld [vmem:[%s2775_s23 + $0x48] sm:$0xff]  ;;  %v160_v1 = vld [vmem:[%s2775_s23 + $0x50] sm:$0xff]  ;;  %v161_v2 = vld [vmem:[%s2775_s23 + $0x58] sm:$0xff]  ;;  %289 = vmatpush.msra.mxu3 %v134_v15 }
   0x9   :  { %187 = vmatpush.msra.mxu0 %v159_v0  ;;  %216 = vmatpush.msra.mxu1 %v160_v1  ;;  %v156_v4 = vld [vmem:[%s2775_s23 + $0x30] sm:$0xff]  ;;  %v157_v5 = vld [vmem:[%s2775_s23 + $0x38] sm:$0xff]  ;;  %v158_v6 = vld [vmem:[%s2775_s23 + $0x40] sm:$0xff] }
   0xa   :  { %245 = vmatpush.msra.mxu2 %v161_v2  ;;  %v153_v8 = vld [vmem:[%s2775_s23 + $0x18] sm:$0xff]  ;;  %v154_v9 = vld [vmem:[%s2775_s23 + $0x20] sm:$0xff]  ;;  %v155_v10 = vld [vmem:[%s2775_s23 + $0x28] sm:$0xff]  ;;  %1414 = vmatmul.msk.f32.vlgmr.msra.gmra.mxu3 %vm2773_vm0, %v1737_v17 }
   0xb   :  { %188 = vmatpush.msra.mxu0 %v156_v4  ;;  %217 = vmatpush.msra.mxu1 %v157_v5  ;;  %v150_v12 = vld [vmem:[%s2775_s23] sm:$0xff]  ;;  %v151_v13 = vld [vmem:[%s2775_s23 + $0x8] sm:$0xff]  ;;  %v152_v14 = vld [vmem:[%s2775_s23 + $0x10] sm:$0xff] }
   0xc   :  { %246 = vmatpush.msra.mxu2 %v158_v6  ;;  %425 = vmatpush.msrb.mxu3 %v366_v23  ;;  %v135_v30 = vld [vmem:[%s2756_s1 + $0x8] sm:$0xff]  ;;  %v132_v35 = vld [vmem:[%s2758_s5 + $0x10] sm:$0xff]  ;;  %v528_v37 = vld [vmem:[%s2761_s8] sm:$0xff] }
   0xd   :  { %189 = vmatpush.msra.mxu0 %v153_v8  ;;  %218 = vmatpush.msra.mxu1 %v154_v9  ;;  %v482_v36 = vld [vmem:[%s2760_s4 + $0x10] sm:$0xff]  ;;  %v149_v38 = vld [vmem:[%s2757_s6 + $0x18] sm:$0xff]  ;;  %v529_v41 = vld [vmem:[%s2761_s8 + $0x8] sm:$0xff] }
   0xe   :  { %247 = vmatpush.msra.mxu2 %v155_v10  ;;  %549 = vperm.xlu1 %1491, %v531_v33   ;;  %v133_v39 = vld [vmem:[%s2758_s5 + $0x18] sm:$0xff]  ;;  %v367_v40 = vld [vmem:[%s2759_s3 + $0x10] sm:$0xff]  ;;  %v361_v42 = vld [vmem:[%s2762_s7] sm:$0xff] }
   0xf   :  { %190 = vmatpush.msra.mxu0 %v150_v12  ;;  %219 = vmatpush.msra.mxu1 %v151_v13  ;;  %v810_v43 = vld [vmem:[%s2763_s10 + $0x10] sm:$0xff]  ;;  %v362_v44 = vld [vmem:[%s2762_s7 + $0x8] sm:$0xff]  ;;  %v480_v46 = vld [vmem:[%s2760_s4] sm:$0xff] }
  0x10   :  { %248 = vmatpush.msra.mxu2 %v152_v14  ;;  %1402 = vmatmul.msk.f32.vlgmr.msra.gmra.mxu0 %vm2773_vm0, %v146_v16  ;;  %v809_v45 = vld [vmem:[%s2763_s10 + $0x8] sm:$0xff]  ;;  %v938_v47 = vld [vmem:[%s2764_s12 + $0x18] sm:$0xff]  ;;  %v363_v48 = vld [vmem:[%s2762_s7 + $0x10] sm:$0xff] }
  0x11   :  { %1406 = vmatmul.msk.f32.vlgmr.msra.gmra.mxu1 %vm2773_vm0, %v146_v16  ;;  %1410 = vmatmul.msk.f32.vlgmr.msra.gmra.mxu2 %vm2773_vm0, %v146_v16  ;;  %v937_v49 = vld [vmem:[%s2764_s12 + $0x10] sm:$0xff]  ;;  %v935_v50 = vld [vmem:[%s2764_s12] sm:$0xff]  ;;  %v364_v52 = vld [vmem:[%s2762_s7 + $0x18] sm:$0xff] }
  0x12   :  { %315 = vmatpush.msrb.mxu0 %v144_v18  ;;  %344 = vmatpush.msrb.mxu1 %v145_v19  ;;  %v530_v53 = vld [vmem:[%s2761_s8 + $0x10] sm:$0xff]  ;;  %v1299_v54 = vld [vmem:[#allocation2] sm:$0x1]  ;;  %v811_v55 = vld [vmem:[%s2763_s10 + $0x18] sm:$0xff] }
  0x13   :  { %396 = vmatpush.msrb.mxu2 %v365_v22  ;;  %1415 = vmatmul.msk.f32.gmra.mxu3 %vm2773_vm0, %v131_v29  ;;  %v808_v56 = vld [vmem:[%s2763_s10] sm:$0xff]  ;;  %v936_v57 = vld [vmem:[%s2764_s12 + $0x8] sm:$0xff] }
  0x14   :  { %316 = vmatpush.msrb.mxu0 %v141_v20  ;;  %345 = vmatpush.msrb.mxu1 %v142_v21  ;;  %v54_v58 = vld [vmem:[%s2766_s0] sm:$0x77]  ;;  %v55_v8 = vld [vmem:[%s2766_s0 + $0x8] sm:$0x7] }
  0x15   :  { %496 = vperm.xlu0 %1490, %v482_v36   ;;  %486 = vperm.xlu2 %1492, %v480_v46   ;;  %v56_v59 = vmul.f32 %v54_v58, %v54_v58  ;;  %v57_v10 = vmul.f32 %v55_v8, %v55_v8 }
  0x16   :  { %317 = vmatpush.msrb.mxu0 %v138_v24  ;;  %346 = vmatpush.msrb.mxu1 %v139_v25 }
  0x17   :  { %534 = vperm.xlu1 %1491, %v528_v37   ;;  %60 = vst [vmem:[#allocation1] ss:$2 sm:$0xff] %v56_v59 }
  0x18   :  { %1403 = vmatmul.msk.f32.gmra.mxu0 %vm2773_vm0, %v147_v27  ;;  %347 = vmatpush.msrb.mxu1 %v136_v31  ;;  %62 = vst [vmem:[#allocation1 + $0x10] ss:$2 sm:$0xff] %v57_v10 }
  0x19   :  { %1407 = vmatmul.msk.f32.gmra.mxu1 %vm2773_vm0, %v147_v27  ;;  %1411 = vmatmul.msk.f32.gmra.mxu2 %vm2773_vm0, %v147_v27 }
  0x1a   :  { %318 = vmatpush.msrb.mxu0 %v135_v30 }
  0x1b   :  { %1416 = vmatmul.msk.f32.gmra.mxu3 %vm2773_vm0, %v132_v35 }
  0x1c   :  { %454 = vmatpush.msra.mxu0 %v367_v40 }
  0x1d   :  { %539 = vperm.xlu0 %1490, %v529_v41   ;;  %544 = vperm.xlu2 %1492, %v530_v53  }
  0x1e   :  { %v63_v60 = vld.sshfl [vmem:[#allocation1] sm:$0xff pattern:$0x75316420]  ;;  %v64_v61 = vld.sshfl [vmem:[#allocation1 + $0x8] sm:$0xff pattern:$0x75316420] }
  0x1f   :  { %819 = vperm.xlu1 %1491, %v809_v45   ;;  %v70_v62 = vsel %vm69_vm2, %v63_v60, 0.0  ;;  %v77_v0 = vsel %vm69_vm2, %v64_v61, 0.0  ;;  %v65_v15 = vld.sshfl [vmem:[#allocation1 + $0x10] sm:$0xff pattern:$0x75316420] }
  0x20   :  { %1404 = vmatmul.msk.f32.gmra.mxu0 %vm2773_vm0, %v148_v34  ;;  %v71_v63 = vrot.slane %v70_v62, 4  ;;  %v78_v1 = vrot.slane %v77_v0, 4  ;;  %v84_v16 = vsel %vm69_vm2, %v65_v15, 0.0 }
  0x21   :  { %1408 = vmatmul.msk.f32.gmra.mxu1 %vm2773_vm0, %v148_v34  ;;  %1412 = vmatmul.msk.f32.gmra.mxu2 %vm2773_vm0, %v148_v34  ;;  %v85_v18 = vrot.slane %v84_v16, 4 }
  0x22   :  { %v72_v2 = vadd.f32 %v71_v63, %v70_v62  ;;  %v79_v3 = vadd.f32 %v78_v1, %v77_v0 }
  0x23   :  { %1417 = vmatmul.msk.f32.gmra.mxu3 %vm2773_vm0, %v133_v39  ;;  %v86_v21 = vadd.f32 %v85_v18, %v84_v16 }
  0x24   :  { %v73_v4 = vrot.slane %v72_v2, 2  ;;  %v80_v5 = vrot.slane %v79_v3, 2 }
  0x25   :  { %824 = vperm.xlu0 %1490, %v810_v43   ;;  %829 = vperm.xlu2 %1492, %v811_v55   ;;  %v87_v24 = vrot.slane %v86_v21, 2 }
  0x26   :  { %v74_v6 = vadd.f32 %v73_v4, %v72_v2  ;;  %v81_v7 = vadd.f32 %v80_v5, %v79_v3 }
  0x27   :  { %951 = vperm.xlu1 %1491, %v937_v49  }
  0x28   :  { %1405 = vmatmul.msk.f32.gmra.mxu0 %vm2773_vm0, %v149_v38  ;;  %v75_v9 = vrot.slane %v74_v6, 1  ;;  %v82_v11 = vrot.slane %v81_v7, 1 }
  0x29   :  { %1409 = vmatmul.msk.f32.gmra.mxu1 %vm2773_vm0, %v149_v38  ;;  %1413 = vmatmul.msk.f32.gmra.mxu2 %vm2773_vm0, %v149_v38 }
  0x2a   :  { %v76_v12 = vadd.f32 %v75_v9, %v74_v6  ;;  %v83_v13 = vadd.f32 %v82_v11, %v81_v7 }
  0x2b   :  { %1430 = vmatmul.msk.f32.vlgmr.msrb.gmra.mxu3 %vm368_vm1, %v361_v42 }
  0x2c   :  { %v91_v14 = vmul.f32 %v76_v12, %v76_v12 }
  0x2d   :  { %956 = vperm.xlu0 %1490, %v938_v47   ;;  %814 = vperm.xlu2 %1492, %v808_v56  }
  0x2e   :  { %v94_v19 = vmax.f32 %v91_v14, 1e-24 }
  0x2f   :  { %1302 = vperm.xlu1 %1491, %v1299_v54  }
  0x30   :  { %1418 = vmatmul.msk.f32.vlgmr.msrb.gmra.mxu0 %vm2773_vm0, %v1737_v17  ;;  %1493 = vrsqrt.f32 %v94_v19  ;;  %vm103_vm3 = vweird.f32 %v94_v19 }
  0x31   :  { %1422 = vmatmul.msk.f32.vlgmr.msrb.gmra.mxu1 %vm2773_vm0, %v1737_v17  ;;  %1426 = vmatmul.msk.f32.vlgmr.msrb.gmra.mxu2 %vm368_vm1, %v361_v42  ;;  %v92_v17 = vmul.f32 %v83_v13, %v83_v13 }
  0x33   :  { %1431 = vmatmul.msk.f32.gmra.mxu3 %vm368_vm1, %v362_v44  ;;  %v95_v22 = vmax.f32 %v92_v17, 1e-24 }
  0x35   :  { %941 = vperm.xlu0 %1490, %v935_v50   ;;  %946 = vperm.xlu2 %1492, %v936_v57   ;;  %1495 = vrsqrt.f32 %v95_v22  ;;  %vm113_vm6 = vweird.f32 %v95_v22 }
  0x36   :  { %v1494_v27 = vpop.eup %1493 }
  0x37   :  { %v98_v31 = vmul.f32 %v1494_v27, %v94_v19  ;;  %vm104_vm4 = vweird.f32 %v1494_v27 }
  0x38   :  { %1419 = vmatmul.msk.f32.gmra.mxu0 %vm2773_vm0, %v131_v29  ;;  %vm105_vm5 = vmor %vm103_vm3, %vm104_vm4 }
  0x39   :  { %1423 = vmatmul.msk.f32.gmra.mxu1 %vm2773_vm0, %v131_v29  ;;  %1427 = vmatmul.msk.f32.gmra.mxu2 %vm368_vm1, %v362_v44  ;;  %v88_v29 = vadd.f32 %v87_v24, %v86_v21  ;;  %v99_v37 = vmul.f32 %v1494_v27, %v98_v31 }
  0x3b   :  { %1432 = vmatmul.msk.f32.gmra.mxu3 %vm368_vm1, %v363_v48  ;;  %v1496_v30 = vpop.eup %1495  ;;  %v89_v33 = vrot.slane %v88_v29, 1  ;;  %v100_v41 = vmul.f32 0.5, %v99_v37 }
  0x3c   :  { %v108_v34 = vmul.f32 %v1496_v30, %v95_v22  ;;  %vm114_vm7 = vweird.f32 %v1496_v30 }
  0x3d   :  { %vm115_vm8 = vmor %vm113_vm6, %vm114_vm7 }
  0x3e   :  { %v109_v40 = vmul.f32 %v1496_v30, %v108_v34 }
  0x40   :  { %1420 = vmatmul.msk.f32.gmra.mxu0 %vm2773_vm0, %v132_v35  ;;  %v110_v45 = vmul.f32 0.5, %v109_v40 }
  0x41   :  { %1424 = vmatmul.msk.f32.gmra.mxu1 %vm2773_vm0, %v132_v35  ;;  %1428 = vmatmul.msk.f32.gmra.mxu2 %vm368_vm1, %v363_v48 }
  0x42   :  { %v111_v51 = vsub.f32 1.5, %v110_v45 }
  0x43   :  { %1433 = vmatmul.msk.f32.gmra.mxu3 %vm368_vm1, %v364_v52 }
  0x44   :  { %v112_v54 = vmul.f32 %v1496_v30, %v111_v51 }
  0x46   :  { %v116_v62 = vsel %vm115_vm8, %v1496_v30, %v112_v54 }
  0x47   :  { %v1944_v2 = vmul.f32 %v116_v62, %v83_v13 }
  0x48   :  { %1421 = vmatmul.msk.f32.gmra.mxu0 %vm2773_vm0, %v133_v39 }
  0x49   :  { %1425 = vmatmul.msk.f32.gmra.mxu1 %vm2773_vm0, %v133_v39  ;;  %1429 = vmatmul.msk.f32.gmra.mxu2 %vm368_vm1, %v364_v52  ;;  %v1909_v39 = vadd.f32 %v89_v33, %v88_v29 }
  0x4b   :  { %v93_v43 = vmul.f32 %v1909_v39, %v1909_v39 }
  0x4d   :  { %v1923_v50 = vmax.f32 %v93_v43, 1e-24 }
  0x4f   :  { %1497 = vrsqrt.f32 %v1923_v50  ;;  %vm123_vm9 = vweird.f32 %v1923_v50 }
  0x50   :  { %1434 = vmatmul.msk.f32.vlgmr.msra.gmra.mxu0 %vm368_vm1, %v361_v42 }
  0x55   :  { %v1936_v61 = vpop.eup %1497 }
  0x56   :  { %v118_v1 = vmul.f32 %v1936_v61, %v1923_v50  ;;  %vm124_vm10 = vweird.f32 %v1936_v61 }
  0x57   :  { %vm1985_vm11 = vmor %vm123_vm9, %vm124_vm10 }
  0x58   :  { %1435 = vmatmul.msk.f32.gmra.mxu0 %vm368_vm1, %v362_v44  ;;  %v119_v11 = vmul.f32 %v1936_v61, %v118_v1 }
  0x5a   :  { %v120_v18 = vmul.f32 0.5, %v119_v11 }
  0x5c   :  { %v121_v33 = vsub.f32 1.5, %v120_v18 }
  0x5e   :  { %v122_v43 = vmul.f32 %v1936_v61, %v121_v33 }
  0x60   :  { %1436 = vmatmul.msk.f32.gmra.mxu0 %vm368_vm1, %v363_v48  ;;  %v101_v48 = vsub.f32 1.5, %v100_v41 }
  0x68   :  { %1437 = vmatmul.msk.f32.gmra.mxu0 %vm368_vm1, %v364_v52  ;;  %v102_v52 = vmul.f32 %v1494_v27, %v101_v48 }
  0x6a   :  { %v106_v56 = vsel %vm105_vm5, %v1494_v27, %v102_v52 }
  0x6b   :  { %v1938_v63 = vmul.f32 %v106_v56, %v76_v12 }
  0x6f   :  { %v1940_v0 = vpop.permute.xlu2 %486 }
  0x70   :  { %v504_v4 = vmul.f32 %v1940_v0, %v1938_v63  ;;  %v505_v12 = vmul.f32 %v1940_v0, %v1944_v2 }
  0x78   :  { %v1911_v42 = vpop.permute.xlu1 %491 }
  0x79   :  { %v1926_v53 = vpop.permute.xlu0 %501  ;;  %v507_v19 = vmul.f32 %v1911_v42, %v1938_v63  ;;  %v508_v22 = vmul.f32 %v1911_v42, %v1944_v2 }
  0x80   :  { %v1928_v55 = vpop.permute.xlu1 %549 }
  0x87   :  { %v1948_v5 = vpop.permute.xlu0 %496 }
  0x88   :  { %v510_v45 = vmul.f32 %v1948_v5, %v1938_v63  ;;  %v511_v54 = vmul.f32 %v1948_v5, %v1944_v2 }
  0x89   :  { %v1953_v15 = vpop.permute.xlu1 %534 }
  0x8d   :  { %v192_v20 = vpop.f32.mrf.mxu0  ;;  %v291_v26 = vpop.f32.mrf.mxu3 }
  0x8e   :  { %v221_v23 = vpop.f32.mrf.mxu1  ;;  %v292_v3 = vadd.f32 %v291_v26, %v192_v20 }
  0x8f   :  { %v1967_v37 = vpop.permute.xlu0 %539 }
  0x94   :  { %v1901_v25 = vpop.f32.mrf.mxu2 }
  0x95   :  { %v1903_v28 = vpop.f32.mrf.mxu0 }
  0x96   :  { %v224_v32 = vpop.f32.mrf.mxu1  ;;  %v294_v36 = vpop.f32.mrf.mxu3 }
  0x97   :  { %v295_v21 = vadd.f32 %v294_v36, %v1903_v28 }
  0x9c   :  { %v1905_v35 = vpop.f32.mrf.mxu2 }
  0x9d   :  { %v1907_v38 = vpop.f32.mrf.mxu0 }
  0x9e   :  { %v1915_v44 = vpop.f32.mrf.mxu1  ;;  %v1919_v47 = vpop.f32.mrf.mxu3 }
  0x9f   :  { %v298_v50 = vadd.f32 %v1919_v47, %v1907_v38 }
  0xa4   :  { %v1917_v46 = vpop.f32.mrf.mxu2 }
  0xa5   :  { %v1921_v49 = vpop.f32.mrf.mxu0 }
  0xa6   :  { %v1932_v58 = vpop.f32.mrf.mxu3  ;;  %v1934_v59 = vpop.f32.mrf.mxu1 }
  0xa7   :  { %v301_v18 = vadd.f32 %v1932_v58, %v1921_v49 }
  0xac   :  { %v1930_v57 = vpop.f32.mrf.mxu2 }
  0xad   :  { %v320_v60 = vpop.f32.mrf.mxu0 }
  0xae   :  { %v321_v6 = vadd.f32 %v320_v60, %v221_v23  ;;  %v427_v8 = vpop.f32.mrf.mxu3  ;;  %v349_v13 = vpop.f32.mrf.mxu1 }
  0xb0   :  { %v469_v14 = vadd.f32 %v427_v8, %v321_v6  ;;  %v1999_v8 = vpop.permute.xlu2 %544 }
  0xb2   :  { %v517_v20 = vadd.f32 %v505_v12, %v469_v14  ;;  %v513_v14 = vmul.f32 %v1926_v53, %v1938_v63 }
  0xb4   :  { %v398_v7 = vpop.f32.mrf.mxu2  ;;  %v1965_v34 = vadd.f32 %v1953_v15, %v517_v20 }
  0xb5   :  { %v468_v9 = vadd.f32 %v398_v7, %v292_v3  ;;  %v323_v10 = vpop.f32.mrf.mxu0  ;;  %v126_v7 = vsel %vm1985_vm11, %v1936_v61, %v122_v43  ;;  %v514_v61 = vmul.f32 %v1926_v53, %v1944_v2 }
  0xb6   :  { %v324_v23 = vadd.f32 %v323_v10, %v224_v32  ;;  %v430_v27 = vpop.f32.mrf.mxu3  ;;  %v1971_v32 = vpop.f32.mrf.mxu1  ;;  %v1439_v48 = vmul.f32 -1.442695, %v1965_v34  ;;  %v129_v10 = vmul.f32 %v126_v7, %v1909_v39 }
  0xb7   :  { %v516_v16 = vadd.f32 %v504_v4, %v468_v9 }
  0xb8   :  { %v472_v30 = vadd.f32 %v430_v27, %v324_v23  ;;  %v350_v23 = vadd.f32 %v349_v13, %v1901_v25  ;;  %v506_v2 = vmul.f32 %v1940_v0, %v129_v10  ;;  %v512_v7 = vmul.f32 %v1948_v5, %v129_v10 }
  0xb9   :  { %v1956_v17 = vadd.f32 %v1953_v15, %v516_v16 }
  0xba   :  { %v520_v28 = vadd.f32 %v508_v22, %v472_v30 }
  0xbb   :  { %v1438_v24 = vmul.f32 -1.442695, %v1956_v17 }
  0xbc   :  { %v401_v26 = vpop.f32.mrf.mxu2  ;;  %v1977_v41 = vadd.f32 %v1967_v37, %v520_v28 }
  0xbd   :  { %1499 = vpow2.f32 %v1438_v24  ;;  %v471_v29 = vadd.f32 %v401_v26, %v295_v21  ;;  %v326_v31 = vpop.f32.mrf.mxu0 }
  0xbe   :  { %v327_v56 = vadd.f32 %v326_v31, %v1915_v44  ;;  %v1442_v1 = vmul.f32 -1.442695, %v1977_v41  ;;  %v433_v4 = vpop.f32.mrf.mxu3 }
  0xbf   :  { %v519_v40 = vadd.f32 %v507_v19, %v471_v29  ;;  %v355_v19 = vpop.f32.mrf.mxu1 }
  0xc0   :  { %v475_v38 = vadd.f32 %v433_v4, %v327_v56 }
  0xc1   :  { %v1974_v36 = vadd.f32 %v1967_v37, %v519_v40 }
  0xc2   :  { %v523_v9 = vadd.f32 %v511_v54, %v475_v38  ;;  %v353_v54 = vadd.f32 %v1971_v32, %v1905_v35 }
  0xc3   :  { %v1500_v51 = vpop.eup %1499  ;;  %v1441_v60 = vmul.f32 -1.442695, %v1974_v36 }
  0xc4   :  { %v1993_v62 = vadd.f32 1.0, %v1500_v51  ;;  %v404_v3 = vpop.f32.mrf.mxu2  ;;  %v2007_v12 = vadd.f32 %v1999_v8, %v523_v9 }
  0xc5   :  { %1501 = vpow2.f32 %v1441_v60  ;;  %v474_v6 = vadd.f32 %v404_v3, %v298_v50  ;;  %v329_v47 = vpop.f32.mrf.mxu0  ;;  %v2049_v3 = vmul.f32 %v1926_v53, %v129_v10  ;;  %v356_v53 = vadd.f32 %v355_v19, %v1917_v46 }
  0xc6   :  { %1503 = vpow2.f32 %v1439_v48  ;;  %v330_v20 = vadd.f32 %v329_v47, %v1934_v59  ;;  %v1445_v21 = vmul.f32 -1.442695, %v2007_v12  ;;  %v436_v26 = vpop.f32.mrf.mxu3  ;;  %v509_v48 = vmul.f32 %v1911_v42, %v129_v10 }
  0xc7   :  { %1505 = vrcp.f32 %v1993_v62  ;;  %v522_v44 = vadd.f32 %v510_v45, %v474_v6  ;;  %v358_v42 = vpop.f32.mrf.mxu1  ;;  %v623_v38 = vand.u32 2147483648, %v1993_v62  ;;  %vm617_vm12 = vweird.f32 %v1993_v62 }
  0xc8   :  { %1507 = vpow2.f32 %v1442_v1  ;;  %v478_v58 = vadd.f32 %v436_v26, %v330_v20  ;;  %v621_v5 = vand.u32 2147483647, %v1993_v62 }
  0xc9   :  { %v2004_v11 = vadd.f32 %v1999_v8, %v522_v44  ;;  %v2079_v19 = vor.u32 1.1754944e-38, %v623_v38 }
  0xca   :  { %v526_v13 = vadd.f32 %v514_v61, %v478_v58  ;;  %vm2196_vm10 = vcmp.eq.f32.partialorder %v621_v5, 8.507059e+37 }
  0xcb   :  { %v1502_v16 = vpop.eup %1501  ;;  %v1444_v39 = vmul.f32 -1.442695, %v2004_v11 }
  0xcc   :  { %v1504_v22 = vpop.eup %1503  ;;  %v2019_v24 = vadd.f32 1.0, %v1502_v16  ;;  %v407_v63 = vpop.f32.mrf.mxu2  ;;  %v2035_v28 = vadd.f32 %v1928_v55, %v526_v13 }
  0xcd   :  { %v2021_v27 = vpop.eup %1505  ;;  %1509 = vpow2.f32 %v1444_v39  ;;  %v477_v49 = vadd.f32 %v407_v63, %v301_v18  ;;  %v456_v29 = vpop.f32.mrf.mxu0  ;;  %v2025_v31 = vadd.f32 1.0, %v1504_v22 }
  0xce   :  { %v1508_v59 = vpop.eup %1507  ;;  %1511 = vrcp.f32 %v2019_v24  ;;  %v470_v30 = vadd.f32 %v456_v29, %v350_v23  ;;  %v613_v40 = vmul.f32 %v2021_v27, %v1993_v62  ;;  %v1448_v50 = vmul.f32 -1.442695, %v2035_v28 }
  0xcf   :  { %1513 = vpow2.f32 %v1445_v21  ;;  %v525_v25 = vadd.f32 %v513_v14, %v477_v49  ;;  %v2027_v33 = vadd.f32 1.0, %v1508_v59  ;;  %v668_v44 = vand.u32 2147483648, %v2019_v24 }
  0xd0   :  { %v518_v43 = vadd.f32 %v506_v2, %v470_v30  ;;  %1515 = vrcp.f32 %v2025_v31  ;;  %v614_v60 = vsub.f32 1.0, %v613_v40  ;;  %v636_v46 = vand.u32 2147483647, %v2025_v31 }
  0xd1   :  { %v2032_v0 = vadd.f32 %v1928_v55, %v525_v25  ;;  %1517 = vrcp.f32 %v2027_v33  ;;  %v638_v20 = vand.u32 2147483648, %v2025_v31  ;;  %v666_v21 = vand.u32 2147483647, %v2019_v24 }
  0xd2   :  { %v2052_v4 = vadd.f32 %v1953_v15, %v518_v43  ;;  %v2064_v15 = vadd.f32 %v358_v42, %v1930_v57  ;;  %v615_v14 = vmul.f32 %v2021_v27, %v614_v60  ;;  %v2083_v22 = vor.u32 1.1754944e-38, %v668_v44 }
  0xd3   :  { %v1510_v45 = vpop.eup %1509  ;;  %v1447_v51 = vmul.f32 -1.442695, %v2032_v0  ;;  %v681_v23 = vand.u32 2147483647, %v2027_v33  ;;  %v683_v63 = vand.u32 2147483648, %v2027_v33  ;;  %vm618_vm13 = vweird.f32 %v2021_v27 }
  0xd4   :  { %v2041_v52 = vpop.eup %1511  ;;  %v2046_v56 = vadd.f32 1.0, %v1510_v45  ;;  %v1440_v16 = vmul.f32 -1.442695, %v2052_v4  ;;  %v2093_v49 = vadd.f32 %v2021_v27, %v615_v14  ;;  %vm662_vm1 = vweird.f32 %v2019_v24  ;;  %vm2134_vm4 = vmor %vm617_vm12, %vm618_vm13 }
  0xd5   :  { %v1514_v1 = vpop.eup %1513  ;;  %1519 = vpow2.f32 %v1447_v51  ;;  %v459_v6 = vpop.f32.mrf.mxu0  ;;  %v658_v32 = vmul.f32 %v2041_v52, %v2019_v24  ;;  %vm663_vm15 = vweird.f32 %v2041_v52  ;;  %vm2176_vm13 = vcmp.eq.f32.partialorder %v666_v21, 8.507059e+37 }
  0xd6   :  { %v2055_v47 = vadd.f32 1.0, %v1514_v1  ;;  %1521 = vrcp.f32 %v2046_v56  ;;  %v473_v35 = vadd.f32 %v459_v6, %v353_v54  ;;  %v2068_v61 = vpop.eup %1515  ;;  %v713_v30 = vand.u32 2147483648, %v2046_v56 }
  0xd7   :  { %1523 = vpow2.f32 %v1448_v50  ;;  %v2074_v10 = vpop.eup %1517  ;;  %v659_v18 = vsub.f32 1.0, %v658_v32  ;;  %vm707_vm14 = vweird.f32 %v2046_v56  ;;  %v711_v40 = vand.u32 2147483647, %v2046_v56 }
  0xd8   :  { %1525 = vrcp.f32 %v2055_v47  ;;  %v521_v9 = vadd.f32 %v509_v48, %v473_v35  ;;  %v728_v25 = vand.u32 2147483648, %v2055_v47  ;;  %v673_v50 = vmul.f32 %v2074_v10, %v2027_v33 }
  0xd9   :  { %1527 = vpow2.f32 %v1440_v16  ;;  %v660_v43 = vmul.f32 %v2041_v52, %v659_v18  ;;  %v726_v60 = vand.u32 2147483647, %v2055_v47  ;;  %v2116_v1 = vmul.f32 %v2068_v61, %v2025_v31 }
  0xda   :  { %v2077_v57 = vadd.f32 %v1967_v37, %v521_v9  ;;  %v714_v6 = vor.u32 1.1754944e-38, %v713_v30  ;;  %v2120_v38 = vor.u32 1.1754944e-38, %v728_v25  ;;  %vm2125_vm2 = vcmp.eq.f32.partialorder %v711_v40, 8.507059e+37 }
  0xdb   :  { %v1520_v39 = vpop.eup %1519  ;;  %vm722_vm3 = vweird.f32 %v2055_v47  ;;  %v674_v18 = vsub.f32 1.0, %v673_v50  ;;  %vm678_vm5 = vweird.f32 %v2074_v10  ;;  %v639_v14 = vor.u32 1.1754944e-38, %v638_v20 }
  0xdc   :  { %v2087_v26 = vpop.eup %1521  ;;  %v2089_v2 = vadd.f32 1.0, %v1520_v39  ;;  %v1443_v37 = vmul.f32 -1.442695, %v2077_v57  ;;  %v620_v39 = vsel %vm2134_vm4, %v2021_v27, %v2093_v49  ;;  %vm637_vm4 = vcmp.eq.f32.partialorder %v636_v46, 8.507059e+37 }
  0xdd   :  { %v1524_v58 = vpop.eup %1523  ;;  %v462_v29 = vpop.f32.mrf.mxu0  ;;  %v703_v59 = vmul.f32 %v2087_v26, %v2046_v56  ;;  %vm708_vm6 = vweird.f32 %v2087_v26 }
  0xde   :  { %v2100_v13 = vpop.eup %1525  ;;  %1529 = vrcp.f32 %v2089_v2  ;;  %v2106_v45 = vadd.f32 1.0, %v1524_v58  ;;  %v476_v48 = vadd.f32 %v462_v29, %v356_v53  ;;  %v756_v42 = vand.u32 2147483647, %v2089_v2  ;;  %vm2169_vm11 = vmor %vm707_vm14, %vm708_vm6 }
  0xdf   :  { %v704_v51 = vsub.f32 1.0, %v703_v59  ;;  %1531 = vpow2.f32 %v1443_v37  ;;  %v718_v54 = vmul.f32 %v2100_v13, %v2055_v47  ;;  %v758_v35 = vand.u32 2147483648, %v2089_v2  ;;  %v1528_v16 = vpop.eup %1527 }
  0xe0   :  { %1533 = vrcp.f32 %v2106_v45  ;;  %v524_v32 = vadd.f32 %v512_v7, %v476_v48  ;;  %v2139_v7 = vadd.f32 %v2041_v52, %v660_v43  ;;  %v629_v59 = vsub.f32 1.0, %v2116_v1 }
  0xe1   :  { %v705_v53 = vmul.f32 %v2087_v26, %v704_v51  ;;  %v719_v9 = vsub.f32 1.0, %v718_v54  ;;  %vm752_vm7 = vweird.f32 %v2089_v2  ;;  %vm2154_vm8 = vcmp.eq.f32.partialorder %v756_v42, 8.507059e+37 }
  0xe2   :  { %v2147_v58 = vadd.f32 %v1999_v8, %v524_v32  ;;  %v759_v48 = vor.u32 1.1754944e-38, %v758_v35  ;;  %v2160_v51 = vadd.f32 1.0, %v1528_v16  ;;  %vm723_vm12 = vweird.f32 %v2100_v13  ;;  %v2310_v35 = vld [vmem:[%s2767_s9] sm:$0xff] }
  0xe3   :  { %v706_v29 = vadd.f32 %v2087_v26, %v705_v53  ;;  %v720_v43 = vmul.f32 %v2100_v13, %v719_v9  ;;  %vm2186_vm14 = vcmp.eq.f32.partialorder %v726_v60, 8.507059e+37  ;;  %v773_v60 = vand.u32 2147483648, %v2106_v45  ;;  %vm2225_vm9 = vmor %vm722_vm3, %vm723_vm12 }
  0xe4   :  { %v1530_v37 = vpop.eup %1529  ;;  %v1446_v50 = vmul.f32 -1.442695, %v2147_v58  ;;  %vm2215_vm6 = vcmp.eq.f32.partialorder %v681_v23, 8.507059e+37  ;;  %v630_v47 = vmul.f32 %v2068_v61, %v629_v59 }
  0xe5   :  { %v748_v30 = vmul.f32 %v1530_v37, %v2089_v2  ;;  %v465_v40 = vpop.f32.mrf.mxu0  ;;  %v1532_v8 = vpop.eup %1531  ;;  %vm753_vm0 = vweird.f32 %v1530_v37  ;;  %v710_v56 = vsel %vm2169_vm11, %v2087_v26, %v706_v29  ;;  %v771_v26 = vand.u32 2147483647, %v2106_v45  ;;  %vm2209_vm11 = vmor %vm662_vm1, %vm663_vm15 }
  0xe6   :  { %v479_v54 = vadd.f32 %v465_v40, %v2064_v15  ;;  %v1534_v1 = vpop.eup %1533  ;;  %v675_v15 = vmul.f32 %v2074_v10, %v674_v18  ;;  %1535 = vpow2.f32 %v1446_v50  ;;  %v721_v18 = vadd.f32 %v2100_v13, %v720_v43  ;;  %vm754_vm15 = vmor %vm752_vm7, %vm753_vm0 }
  0xe7   :  { %v749_v32 = vsub.f32 1.0, %v748_v30  ;;  %v763_v53 = vmul.f32 %v1534_v1, %v2106_v45  ;;  %v2191_v30 = vadd.f32 1.0, %v1532_v8  ;;  %v715_v8 = vsel %vm2125_vm2, %v714_v6, %v710_v56 }
  0xe8   :  { %v527_v9 = vadd.f32 %v2049_v3, %v479_v54  ;;  %v665_v24 = vsel %vm2209_vm11, %v2041_v52, %v2139_v7  ;;  %v676_v23 = vadd.f32 %v2074_v10, %v675_v15  ;;  %vm768_vm1 = vweird.f32 %v1534_v1 }
  0xe9   :  { %v750_v21 = vmul.f32 %v1530_v37, %v749_v32  ;;  %v764_v40 = vsub.f32 1.0, %v763_v53  ;;  %1537 = vrcp.f32 %v2191_v30  ;;  %v725_v54 = vsel %vm2225_vm9, %v2100_v13, %v721_v18 }
  0xea   :  { %v2203_v29 = vadd.f32 %v1928_v55, %v527_v9  ;;  %vm633_vm2 = vweird.f32 %v2068_v61  ;;  %vm2798_vm0 = vweird.f32 %v2027_v33  ;;  %vm2801_vm7 = vweird.f32 %v2106_v45 }
  0xeb   :  { %v751_v5 = vadd.f32 %v1530_v37, %v750_v21  ;;  %v765_v6 = vmul.f32 %v1534_v1, %v764_v40  ;;  %vm2250_vm3 = vmor %vm2798_vm0, %vm678_vm5  ;;  %vm772_vm12 = vcmp.eq.f32.partialorder %v771_v26, 8.507059e+37  ;;  %v774_v25 = vor.u32 1.1754944e-38, %v773_v60 }
  0xec   :  { %v1449_v44 = vmul.f32 -1.442695, %v2203_v29  ;;  %v1536_v59 = vpop.eup %1535  ;;  %vm769_vm9 = vmor %vm2801_vm7, %vm768_vm1  ;;  %v670_v42 = vsel %vm2176_vm13, %v2083_v22, %v665_v24  ;;  %v680_v15 = vsel %vm2250_vm3, %v2074_v10, %v676_v23  ;;  %v730_v45 = vsel %vm2186_vm14, %v2120_v38, %v725_v54 }
  0xed   :  { %v755_v50 = vsel %vm754_vm15, %v1530_v37, %v751_v5  ;;  %v766_v2 = vadd.f32 %v1534_v1, %v765_v6  ;;  %v631_v37 = vadd.f32 %v2068_v61, %v630_v47  ;;  %v2259_v32 = vadd.f32 1.0, %v1536_v59 }
  0xee   :  { %v760_v52 = vsel %vm2154_vm8, %v759_v48, %v755_v50  ;;  %1539 = vpow2.f32 %v1449_v44  ;;  %vm2802_vm5 = vweird.f32 %v2025_v31  ;;  %v799_v49 = vmul.f32 %v730_v45, %v2007_v12 }
  0xef   :  { %v801_v13 = vmul.f32 %v760_v52, %v2032_v0  ;;  %1541 = vrcp.f32 %v2160_v51  ;;  %v770_v48 = vsel %vm769_vm9, %v1534_v1, %v766_v2  ;;  %v798_v0 = vmul.f32 %v715_v8, %v2004_v11  ;;  %vm2277_vm8 = vmor %vm2802_vm5, %vm633_vm2 }
  0xf0   :  { %v775_v53 = vsel %vm772_vm12, %v774_v25, %v770_v48  ;;  %v684_v1 = vor.u32 1.1754944e-38, %v683_v63  ;;  %1543 = vrcp.f32 %v2259_v32  ;;  %v625_v11 = vsel %vm2196_vm10, %v2079_v19, %v620_v39  ;;  %v2294_v63 = vpop.eup %1537 }
  0xf1   :  { %856 = vmatpush.msra.mxu1 %v801_v13  ;;  %v802_v10 = vmul.f32 %v775_v53, %v2035_v28  ;;  %v635_v33 = vsel %vm2277_vm8, %v2068_v61, %v631_v37  ;;  %v795_v28 = vmul.f32 %v670_v42, %v1974_v36  ;;  %v792_v39 = vmul.f32 %v625_v11, %v1956_v17  ;;  %v806_v37 = vld [vmem:[%s2767_s9 + $0x10] sm:$0xff] }
  0xf2   :  { %v685_v38 = vsel %vm2215_vm6, %v684_v1, %v680_v15  ;;  %v640_v36 = vsel %vm637_vm4, %v639_v14, %v635_v33  ;;  %v688_v12 = vmul.f32 %v2294_v63, %v2191_v30  ;;  %vm2805_vm10 = vcmask 261120  }
  0xf3   :  { %857 = vmatpush.msra.mxu1 %v798_v0  ;;  %885 = vmatpush.msra.mxu2 %v802_v10  ;;  %v796_v20 = vmul.f32 %v685_v38, %v1977_v41  ;;  %v793_v46 = vmul.f32 %v640_v36, %v1965_v34  ;;  %vm2806_vm13 = vmmov %vm2805_vm10  ;;  %v2326_v34 = vld [vmem:[%s2767_s9 + $0x8] sm:$0xff]  ;;  %vm692_vm14 = vweird.f32 %v2191_v30  ;;  %vm693_vm6 = vweird.f32 %v2294_v63 }
  0xf4   :  { %v1540_v27 = vpop.eup %1539  ;;  %v689_v56 = vsub.f32 1.0, %v688_v12  ;;  %vm2807_vm11 = vmmov %vm2805_vm10  ;;  %vm737_vm1 = vweird.f32 %v2259_v32  ;;  %v741_v5 = vand.u32 2147483647, %v2259_v32  ;;  %v743_v8 = vand.u32 2147483648, %v2259_v32 }
  0xf5   :  { %v2304_v19 = vpop.eup %1541  ;;  %v611_v61 = vadd.f32 1.0, %v1540_v27  ;;  %858 = vmatpush.msra.mxu1 %v795_v28  ;;  %886 = vmatpush.msra.mxu2 %v799_v49  ;;  %vm2808_vm0 = vmmov %vm2805_vm10  ;;  %v696_v44 = vand.u32 2147483647, %v2191_v30  ;;  %v698_v47 = vand.u32 2147483648, %v2191_v30  ;;  %vm647_vm7 = vweird.f32 %v2160_v51  ;;  %v825_v49 = vpop.permute.xlu0 %824 }
  0xf6   :  { %v1544_v31 = vpop.eup %1543  ;;  %v643_v17 = vmul.f32 %v2304_v19, %v2160_v51  ;;  %v690_v40 = vmul.f32 %v2294_v63, %v689_v56  ;;  %vm648_vm9 = vweird.f32 %v2304_v19  ;;  %vm2354_vm5 = vmor %vm692_vm14, %vm693_vm6  ;;  %v744_v59 = vor.u32 1.1754944e-38, %v743_v8 }
  0xf7   :  { %1545 = vrcp.f32 %v611_v61  ;;  %859 = vmatpush.msra.mxu1 %v792_v39  ;;  %887 = vmatpush.msra.mxu2 %v796_v20  ;;  %v733_v9 = vmul.f32 %v1544_v31, %v2259_v32  ;;  %vm738_vm15 = vweird.f32 %v1544_v31  ;;  %v788_v62 = vand.u32 2147483648, %v611_v61  ;;  %vm2813_vm14 = vmmov %vm2808_vm0 }
  0xf8   :  { %1450 = vmatmul.msk.f32.vlgmr.msra.gmra.mxu1 %vm2805_vm10, %v2310_v35  ;;  %v644_v16 = vsub.f32 1.0, %v643_v17  ;;  %v786_v24 = vand.u32 2147483647, %v611_v61  ;;  %v691_v23 = vadd.f32 %v2294_v63, %v690_v40  ;;  %vm2340_vm3 = vmor %vm737_vm1, %vm738_vm15  ;;  %vm782_vm12 = vweird.f32 %v611_v61  ;;  %v931_v17 = vld [vmem:[%s2769_s11] sm:$0xff] }
  0xf9   :  { %888 = vmatpush.msra.mxu2 %v793_v46  ;;  %v734_v41 = vsub.f32 1.0, %v733_v9  ;;  %v789_v7 = vor.u32 1.1754944e-38, %v788_v62  ;;  %v651_v13 = vand.u32 2147483647, %v2160_v51  ;;  %v653_v25 = vand.u32 2147483648, %v2160_v51  ;;  %vm2814_vm15 = vmmov %vm2808_vm0 }
  0xfa   :  { %1454 = vmatmul.msk.f32.vlgmr.msra.gmra.mxu2 %vm2806_vm13, %v2310_v35  ;;  %v645_v43 = vmul.f32 %v2304_v19, %v644_v16  ;;  %vm787_vm4 = vcmp.eq.f32.partialorder %v786_v24, 8.507059e+37  ;;  %vm742_vm10 = vcmp.eq.f32.partialorder %v741_v5, 8.507059e+37  ;;  %v695_v30 = vsel %vm2354_vm5, %v2294_v63, %v691_v23  ;;  %vm649_vm13 = vmor %vm647_vm7, %vm648_vm9 }
  0xfb   :  { %v735_v18 = vmul.f32 %v1544_v31, %v734_v41  ;;  %v699_v15 = vor.u32 1.1754944e-38, %v698_v47  ;;  %vm697_vm6 = vcmp.eq.f32.partialorder %v696_v44, 8.507059e+37  ;;  %v654_v1 = vor.u32 1.1754944e-38, %v653_v25  ;;  %vm2815_vm1 = vmmov %vm2808_vm0 }
  0xfc   :  { %v646_v2 = vadd.f32 %v2304_v19, %v645_v43  ;;  %vm2818_vm7 = vmmov %vm2808_vm0 }
  0xfd   :  { %v1546_v21 = vpop.eup %1545  ;;  %v736_v60 = vadd.f32 %v1544_v31, %v735_v18  ;;  %v700_v45 = vsel %vm697_vm6, %v699_v15, %v695_v30  ;;  %vm2819_vm9 = vmmov %vm2808_vm0  ;;  %v2449_v62 = vpop.permute.xlu0 %956 }
  0xfe   :  { %v778_v3 = vmul.f32 %v1546_v21, %v611_v61  ;;  %vm783_vm2 = vweird.f32 %v1546_v21  ;;  %v650_v0 = vsel %vm649_vm13, %v2304_v19, %v646_v2  ;;  %v797_v51 = vmul.f32 %v700_v45, %v2077_v57  ;;  %v830_v57 = vpop.permute.xlu2 %829  ;;  %vm2821_vm5 = vmmov %vm2808_vm0 }
  0xff   :  { %v740_v54 = vsel %vm2340_vm3, %v1544_v31, %v736_v60  ;;  %vm784_vm8 = vmor %vm782_vm12, %vm783_vm2  ;;  %v934_v60 = vld [vmem:[%s2769_s11 + $0x18] sm:$0xff] }
 0x100   :  { %v779_v26 = vsub.f32 1.0, %v778_v3  ;;  %1451 = vmatmul.msk.f32.gmra.mxu1 %vm2807_vm11, %v2326_v34  ;;  %v745_v42 = vsel %vm742_vm10, %v744_v59, %v740_v54  ;;  %vm652_vm11 = vcmp.eq.f32.partialorder %v651_v13, 8.507059e+37  ;;  %vm2816_vm2 = vmmov %vm2808_vm0  ;;  %v933_v3 = vld [vmem:[%s2769_s11 + $0x10] sm:$0xff] }
 0x101   :  { %v800_v22 = vmul.f32 %v745_v42, %v2147_v58  ;;  %v655_v10 = vsel %vm652_vm11, %v654_v1, %v650_v0  ;;  %vm2817_vm3 = vmmov %vm2808_vm0 }
 0x102   :  { %v780_v55 = vmul.f32 %v1546_v21, %v779_v26  ;;  %1455 = vmatmul.msk.f32.gmra.mxu2 %vm2808_vm0, %v2326_v34  ;;  %v794_v11 = vmul.f32 %v655_v10, %v2052_v4  ;;  %v820_v4 = vpop.permute.xlu1 %819  ;;  %vm2820_vm12 = vmmov %vm2808_vm0 }
 0x103   :  { %vm2824_vm10 = vmmov %vm2808_vm0 }
 0x104   :  { %v781_v50 = vadd.f32 %v1546_v21, %v780_v55  ;;  %vm2825_vm13 = vmmov %vm2808_vm0 }
 0x105   :  { %vm2827_vm6 = vmmov %vm2808_vm0  ;;  %v2451_v5 = vpop.permute.xlu0 %941 }
 0x106   :  { %v785_v48 = vsel %vm784_vm8, %v1546_v21, %v781_v50  ;;  %v815_v58 = vpop.permute.xlu2 %814  ;;  %v932_v21 = vld [vmem:[%s2769_s11 + $0x8] sm:$0xff]  ;;  %vm2822_vm8 = vmmov %vm2808_vm0 }
 0x107   :  { %v790_v32 = vsel %vm787_vm4, %v789_v7, %v785_v48  ;;  %vm2823_vm4 = vmmov %vm2808_vm0 }
 0x108   :  { %v803_v53 = vmul.f32 %v790_v32, %v2203_v29  ;;  %1452 = vmatmul.msk.f32.gmra.mxu1 %vm2813_vm14, %v806_v37  ;;  %v807_v29 = vld [vmem:[%s2767_s9 + $0x18] sm:$0xff]  ;;  %vm2826_vm14 = vmmov %vm2808_vm0 }
 0x109   :  { %vm2828_vm11 = vmmov %vm2808_vm0 }
 0x10a   :  { %914 = vmatpush.msra.mxu3 %v803_v53  ;;  %1456 = vmatmul.msk.f32.gmra.mxu2 %vm2814_vm15, %v806_v37  ;;  %vm2829_vm15 = vmmov %vm2808_vm0  ;;  %v2465_v2 = vpop.permute.xlu1 %951 }
 0x10c   :  { %915 = vmatpush.msra.mxu3 %v800_v22 }
 0x10e   :  { %916 = vmatpush.msra.mxu3 %v797_v51  ;;  %v2457_v23 = vpop.permute.xlu2 %946 }
 0x110   :  { %1453 = vmatmul.msk.f32.gmra.mxu1 %vm2815_vm1, %v807_v29  ;;  %917 = vmatpush.msra.mxu3 %v794_v11  ;;  %vm2830_vm1 = vmmov %vm2808_vm0 }
 0x111   :  { %1458 = vmatmul.msk.f32.vlgmr.msra.gmra.mxu3 %vm2816_vm2, %v2310_v35  ;;  %vm2831_vm2 = vmmov %vm2808_vm0 }
 0x112   :  { %1457 = vmatmul.msk.f32.gmra.mxu2 %vm2808_vm0, %v807_v29 }
 0x119   :  { %1459 = vmatmul.msk.f32.gmra.mxu3 %vm2817_vm3, %v2326_v34 }
 0x121   :  { %1460 = vmatmul.msk.f32.gmra.mxu3 %vm2818_vm7, %v806_v37 }
 0x129   :  { %1461 = vmatmul.msk.f32.gmra.mxu3 %vm2819_vm9, %v807_v29 }
 0x175   :  { %v861_v33 = vpop.f32.mrf.mxu1 }
 0x176   :  { %v862_v63 = vadd.f32 %v861_v33, %v815_v58 }
 0x178   :  { %1369 = vst [vmem:[%s2768_s15] sm:$0xff] %v862_v63 }
 0x17d   :  { %v864_v28 = vpop.f32.mrf.mxu1  ;;  %v890_v38 = vpop.f32.mrf.mxu2 }
 0x17e   :  { %v865_v14 = vadd.f32 %v864_v28, %v820_v4  ;;  %v891_v27 = vadd.f32 %v890_v38, %v815_v58 }
 0x180   :  { %1372 = vst [vmem:[%s2768_s15 + $0x18] sm:$0xff] %v865_v14 }
 0x181   :  { %1370 = vst [vmem:[%s2768_s15 + $0x8] sm:$0xff] %v891_v27 }
 0x185   :  { %v867_v19 = vpop.f32.mrf.mxu1  ;;  %v893_v61 = vpop.f32.mrf.mxu2 }
 0x186   :  { %v868_v39 = vadd.f32 %v867_v19, %v825_v49  ;;  %v894_v36 = vadd.f32 %v893_v61, %v820_v4 }
 0x188   :  { %1375 = vst [vmem:[%s2768_s15 + $0x30] sm:$0xff] %v868_v39 }
 0x189   :  { %1373 = vst [vmem:[%s2768_s15 + $0x20] sm:$0xff] %v894_v36 }
 0x18d   :  { %v870_v35 = vpop.f32.mrf.mxu1  ;;  %v896_v20 = vpop.f32.mrf.mxu2 }
 0x18e   :  { %v871_v12 = vadd.f32 %v870_v35, %v830_v57  ;;  %v897_v31 = vadd.f32 %v896_v20, %v825_v49 }
 0x190   :  { %1378 = vst [vmem:[%s2768_s15 + $0x48] sm:$0xff] %v871_v12  ;;  %983 = vmatpush.msrb.mxu0 %v871_v12 }
 0x191   :  { %1376 = vst [vmem:[%s2768_s15 + $0x38] sm:$0xff] %v897_v31 }
 0x192   :  { %984 = vmatpush.msrb.mxu0 %v868_v39 }
 0x194   :  { %985 = vmatpush.msrb.mxu0 %v865_v14  ;;  %v919_v46 = vpop.f32.mrf.mxu3 }
 0x195   :  { %v920_v9 = vadd.f32 %v919_v46, %v815_v58  ;;  %v899_v56 = vpop.f32.mrf.mxu2 }
 0x196   :  { %986 = vmatpush.msrb.mxu0 %v862_v63  ;;  %v900_v41 = vadd.f32 %v899_v56, %v830_v57 }
 0x197   :  { %1371 = vst [vmem:[%s2768_s15 + $0x10] sm:$0xff] %v920_v9  ;;  %1462 = vmatmul.msk.f32.vlgmr.msrb.gmra.mxu0 %vm2820_vm12, %v931_v17 }
 0x198   :  { %1379 = vst [vmem:[%s2768_s15 + $0x50] sm:$0xff] %v900_v41  ;;  %1012 = vmatpush.msrb.mxu1 %v900_v41 }
 0x19a   :  { %1013 = vmatpush.msrb.mxu1 %v897_v31 }
 0x19c   :  { %v922_v16 = vpop.f32.mrf.mxu3  ;;  %1014 = vmatpush.msrb.mxu1 %v894_v36 }
 0x19d   :  { %v923_v34 = vadd.f32 %v922_v16, %v820_v4 }
 0x19e   :  { %1015 = vmatpush.msrb.mxu1 %v891_v27 }
 0x19f   :  { %1374 = vst [vmem:[%s2768_s15 + $0x28] sm:$0xff] %v923_v34  ;;  %1463 = vmatmul.msk.f32.gmra.mxu0 %vm2821_vm5, %v932_v21  ;;  %1466 = vmatmul.msk.f32.vlgmr.msrb.gmra.mxu1 %vm2822_vm8, %v931_v17 }
 0x1a4   :  { %v925_v18 = vpop.f32.mrf.mxu3 }
 0x1a5   :  { %v926_v40 = vadd.f32 %v925_v18, %v825_v49 }
 0x1a7   :  { %1377 = vst [vmem:[%s2768_s15 + $0x40] sm:$0xff] %v926_v40  ;;  %1464 = vmatmul.msk.f32.gmra.mxu0 %vm2823_vm4, %v933_v3  ;;  %1467 = vmatmul.msk.f32.gmra.mxu1 %vm2824_vm10, %v932_v21 }
 0x1ac   :  { %v928_v26 = vpop.f32.mrf.mxu3 }
 0x1ad   :  { %v929_v43 = vadd.f32 %v928_v26, %v830_v57 }
 0x1af   :  { %1380 = vst [vmem:[%s2768_s15 + $0x58] sm:$0xff] %v929_v43  ;;  %1465 = vmatmul.msk.f32.gmra.mxu0 %vm2825_vm13, %v934_v60  ;;  %1041 = vmatpush.msrb.mxu2 %v929_v43 }
 0x1b0   :  { %1468 = vmatmul.msk.f32.gmra.mxu1 %vm2826_vm14, %v933_v3 }
 0x1b1   :  { %1042 = vmatpush.msrb.mxu2 %v926_v40 }
 0x1b3   :  { %1043 = vmatpush.msrb.mxu2 %v923_v34 }
 0x1b5   :  { %1044 = vmatpush.msrb.mxu2 %v920_v9 }
 0x1b6   :  { %1470 = vmatmul.msk.f32.vlgmr.msrb.gmra.mxu2 %vm2827_vm6, %v931_v17 }
 0x1b8   :  { %1469 = vmatmul.msk.f32.gmra.mxu1 %vm2828_vm11, %v934_v60 }
 0x1be   :  { %1471 = vmatmul.msk.f32.gmra.mxu2 %vm2829_vm15, %v932_v21 }
 0x1c6   :  { %1472 = vmatmul.msk.f32.gmra.mxu2 %vm2830_vm1, %v933_v3 }
 0x1ce   :  { %1473 = vmatmul.msk.f32.gmra.mxu2 %vm2831_vm2, %v934_v60 }
 0x214   :  { %v988_v8 = vpop.f32.mrf.mxu0 }
 0x215   :  { %v2454_v55 = vadd.f32 %v988_v8, %v2451_v5 }
 0x217   :  { %v1474_v24 = vmul.f32 -1.442695, %v2454_v55 }
 0x219   :  { %1547 = vpow2.f32 %v1474_v24 }
 0x21c   :  { %v991_v6 = vpop.f32.mrf.mxu0  ;;  %v1017_v44 = vpop.f32.mrf.mxu1 }
 0x21d   :  { %v2460_v47 = vadd.f32 %v991_v6, %v2457_v23  ;;  %v2468_v7 = vadd.f32 %v1017_v44, %v2451_v5 }
 0x21f   :  { %v1548_v50 = vpop.eup %1547  ;;  %v1477_v54 = vmul.f32 -1.442695, %v2460_v47  ;;  %v1475_v32 = vmul.f32 -1.442695, %v2468_v7 }
 0x220   :  { %v2463_v52 = vadd.f32 1.0, %v1548_v50 }
 0x221   :  { %1549 = vpow2.f32 %v1477_v54 }
 0x222   :  { %1551 = vrcp.f32 %v2463_v52  ;;  %v1115_v36 = vand.u32 2147483647, %v2463_v52  ;;  %v1117_v20 = vand.u32 2147483648, %v2463_v52  ;;  %vm1111_vm3 = vweird.f32 %v2463_v52 }
 0x224   :  { %v994_v37 = vpop.f32.mrf.mxu0  ;;  %v1020_v59 = vpop.f32.mrf.mxu1  ;;  %vm1116_vm9 = vcmp.eq.f32.partialorder %v1115_v36, 8.507059e+37  ;;  %v1118_v3 = vor.u32 1.1754944e-38, %v1117_v20 }
 0x225   :  { %v2472_v13 = vadd.f32 %v994_v37, %v2465_v2  ;;  %v2475_v25 = vadd.f32 %v1020_v59, %v2457_v23 }
 0x227   :  { %v1550_v48 = vpop.eup %1549  ;;  %v1480_v30 = vmul.f32 -1.442695, %v2472_v13  ;;  %v1478_v15 = vmul.f32 -1.442695, %v2475_v25 }
 0x228   :  { %v2479_v42 = vadd.f32 1.0, %v1550_v48  ;;  %v2482_v53 = vpop.eup %1551 }
 0x229   :  { %1553 = vpow2.f32 %v1480_v30  ;;  %v1107_v22 = vmul.f32 %v2482_v53, %v2463_v52  ;;  %vm1112_vm0 = vweird.f32 %v2482_v53 }
 0x22a   :  { %1555 = vpow2.f32 %v1475_v32  ;;  %v1162_v41 = vand.u32 2147483648, %v2479_v42  ;;  %vm2526_vm7 = vmor %vm1111_vm3, %vm1112_vm0  ;;  %vm1156_vm12 = vweird.f32 %v2479_v42  ;;  %v1160_v44 = vand.u32 2147483647, %v2479_v42 }
 0x22b   :  { %1557 = vrcp.f32 %v2479_v42  ;;  %v1108_v58 = vsub.f32 1.0, %v1107_v22 }
 0x22c   :  { %v997_v0 = vpop.f32.mrf.mxu0  ;;  %1559 = vpow2.f32 %v1478_v15  ;;  %v1163_v50 = vor.u32 1.1754944e-38, %v1162_v41  ;;  %vm1161_vm2 = vcmp.eq.f32.partialorder %v1160_v44, 8.507059e+37 }
 0x22d   :  { %v1023_v45 = vpop.f32.mrf.mxu1  ;;  %v2486_v1 = vadd.f32 %v997_v0, %v2449_v62  ;;  %v1109_v14 = vmul.f32 %v2482_v53, %v1108_v58 }
 0x22e   :  { %v2491_v10 = vadd.f32 %v1023_v45, %v2465_v2 }
 0x22f   :  { %v1554_v51 = vpop.eup %1553  ;;  %v1483_v29 = vmul.f32 -1.442695, %v2486_v1  ;;  %v1110_v17 = vadd.f32 %v2482_v53, %v1109_v14 }
 0x230   :  { %v2494_v11 = vadd.f32 1.0, %v1554_v51  ;;  %v1556_v57 = vpop.eup %1555  ;;  %v1481_v33 = vmul.f32 -1.442695, %v2491_v10 }
 0x231   :  { %1561 = vpow2.f32 %v1483_v29  ;;  %v2498_v63 = vpop.eup %1557  ;;  %v2500_v28 = vadd.f32 1.0, %v1556_v57  ;;  %v1114_v18 = vsel %vm2526_vm7, %v2482_v53, %v1110_v17 }
 0x232   :  { %1563 = vrcp.f32 %v2494_v11  ;;  %v1560_v4 = vpop.eup %1559  ;;  %v1152_v27 = vmul.f32 %v2498_v63, %v2479_v42  ;;  %v1119_v52 = vsel %vm1116_vm9, %v1118_v3, %v1114_v18  ;;  %vm1157_vm5 = vweird.f32 %v2498_v63 }
 0x233   :  { %1565 = vpow2.f32 %v1481_v33  ;;  %v2508_v61 = vadd.f32 1.0, %v1560_v4  ;;  %v1130_v24 = vand.u32 2147483647, %v2500_v28  ;;  %v1132_v6 = vand.u32 2147483648, %v2500_v28  ;;  %vm2574_vm10 = vmor %vm1156_vm12, %vm1157_vm5 }
 0x234   :  { %1567 = vrcp.f32 %v2500_v28  ;;  %v1153_v9 = vsub.f32 1.0, %v1152_v27  ;;  %vm1201_vm8 = vweird.f32 %v2494_v11  ;;  %v1207_v30 = vand.u32 2147483648, %v2494_v11 }
 0x235   :  { %v1026_v38 = vpop.f32.mrf.mxu1  ;;  %v1205_v33 = vand.u32 2147483647, %v2494_v11  ;;  %vm1171_vm3 = vweird.f32 %v2508_v61  ;;  %vm1126_vm7 = vweird.f32 %v2500_v28 }
 0x236   :  { %v2506_v49 = vadd.f32 %v1026_v38, %v2449_v62  ;;  %v1154_v40 = vmul.f32 %v2498_v63, %v1153_v9  ;;  %v1208_v42 = vor.u32 1.1754944e-38, %v1207_v30 }
 0x237   :  { %v1562_v19 = vpop.eup %1561  ;;  %vm1206_vm15 = vcmp.eq.f32.partialorder %v1205_v33, 8.507059e+37 }
 0x238   :  { %v2510_v39 = vpop.eup %1563  ;;  %v2513_v35 = vadd.f32 1.0, %v1562_v19  ;;  %v1484_v31 = vmul.f32 -1.442695, %v2506_v49  ;;  %v1155_v48 = vadd.f32 %v2498_v63, %v1154_v40 }
 0x239   :  { %v1197_v12 = vmul.f32 %v2510_v39, %v2494_v11  ;;  %v1046_v46 = vpop.f32.mrf.mxu2  ;;  %v1566_v56 = vpop.eup %1565  ;;  %vm1202_vm4 = vweird.f32 %v2510_v39 }
 0x23a   :  { %1569 = vrcp.f32 %v2513_v35  ;;  %v2530_v34 = vadd.f32 1.0, %v1566_v56  ;;  %v2536_v26 = vpop.eup %1567  ;;  %v2542_v43 = vadd.f32 %v1046_v46, %v2451_v5  ;;  %v1252_v51 = vand.u32 2147483648, %v2513_v35  ;;  %vm2585_vm14 = vmor %vm1201_vm8, %vm1202_vm4 }
 0x23b   :  { %1571 = vrcp.f32 %v2508_v61  ;;  %v1198_v16 = vsub.f32 1.0, %v1197_v12  ;;  %v1122_v5 = vmul.f32 %v2536_v26, %v2500_v28  ;;  %v1250_v38 = vand.u32 2147483647, %v2513_v35 }
 0x23c   :  { %1573 = vpow2.f32 %v1484_v31  ;;  %v1476_v45 = vmul.f32 -1.442695, %v2542_v43  ;;  %v1159_v14 = vsel %vm2574_vm10, %v2498_v63, %v1155_v48  ;;  %vm1246_vm6 = vweird.f32 %v2513_v35 }
 0x23d   :  { %v1199_v60 = vmul.f32 %v2510_v39, %v1198_v16  ;;  %1575 = vrcp.f32 %v2530_v34  ;;  %v1253_v12 = vor.u32 1.1754944e-38, %v1252_v51  ;;  %v1123_v31 = vsub.f32 1.0, %v1122_v5 }
 0x23e   :  { %vm1251_vm1 = vcmp.eq.f32.partialorder %v1250_v38, 8.507059e+37  ;;  %vm1127_vm0 = vweird.f32 %v2536_v26  ;;  %vm1216_vm5 = vweird.f32 %v2530_v34 }
 0x23f   :  { %v1200_v53 = vadd.f32 %v2510_v39, %v1199_v60 }
 0x240   :  { %v1570_v8 = vpop.eup %1569 }
 0x241   :  { %v2547_v54 = vpop.eup %1571  ;;  %v1242_v37 = vmul.f32 %v1570_v8, %v2513_v35  ;;  %v1049_v59 = vpop.f32.mrf.mxu2  ;;  %vm1247_vm13 = vweird.f32 %v1570_v8  ;;  %v1204_v36 = vsel %vm2585_vm14, %v2510_v39, %v1200_v53  ;;  %v1286_v39 = vmul.f32 %v1119_v52, %v2454_v55 }
 0x242   :  { %v2557_v32 = vadd.f32 %v1049_v59, %v2457_v23  ;;  %v1574_v15 = vpop.eup %1573  ;;  %v1167_v22 = vmul.f32 %v2547_v54, %v2508_v61  ;;  %vm1248_vm11 = vmor %vm1246_vm6, %vm1247_vm13  ;;  %v1209_v9 = vsel %vm1206_vm15, %v1208_v42, %v1204_v36  ;;  %v1164_v35 = vsel %vm1161_vm2, %v1163_v50, %v1159_v14 }
 0x243   :  { %v1243_v0 = vsub.f32 1.0, %v1242_v37  ;;  %v2565_v29 = vadd.f32 1.0, %v1574_v15  ;;  %v2568_v58 = vpop.eup %1575  ;;  %v1175_v55 = vand.u32 2147483647, %v2508_v61  ;;  %v1289_v50 = vmul.f32 %v1164_v35, %v2460_v47 }
 0x244   :  { %v1479_v57 = vmul.f32 -1.442695, %v2557_v32  ;;  %v1212_v19 = vmul.f32 %v2568_v58, %v2530_v34  ;;  %v1168_v63 = vsub.f32 1.0, %v1167_v22  ;;  %vm1172_vm9 = vweird.f32 %v2547_v54 }
 0x245   :  { %v1244_v4 = vmul.f32 %v1570_v8, %v1243_v0  ;;  %1577 = vrcp.f32 %v2565_v29  ;;  %v1220_v52 = vand.u32 2147483647, %v2530_v34  ;;  %vm1217_vm12 = vweird.f32 %v2568_v58  ;;  %vm2649_vm13 = vmor %vm1171_vm3, %vm1172_vm9 }
 0x246   :  { %1579 = vpow2.f32 %v1476_v45  ;;  %v1213_v11 = vsub.f32 1.0, %v1212_v19  ;;  %v1169_v3 = vmul.f32 %v2547_v54, %v1168_v63  ;;  %v1222_v59 = vand.u32 2147483648, %v2530_v34  ;;  %v2628_v45 = vld [vmem:[%s2770_s13] sm:$0x1]  ;;  %vm2634_vm4 = vmor %vm1216_vm5, %vm1217_vm12 }
 0x247   :  { %v1245_v20 = vadd.f32 %v1570_v8, %v1244_v4  ;;  %1581 = vpow2.f32 %v1479_v57  ;;  %v1267_v48 = vand.u32 2147483648, %v2565_v29  ;;  %v1265_v15 = vand.u32 2147483647, %v2565_v29 }
 0x248   :  { %v1214_v16 = vmul.f32 %v2568_v58, %v1213_v11  ;;  %v1177_v34 = vand.u32 2147483648, %v2508_v61  ;;  %vm2638_vm10 = vcmp.eq.f32.partialorder %v1220_v52, 8.507059e+37  ;;  %v1223_v38 = vor.u32 1.1754944e-38, %v1222_v59 }
 0x249   :  { %v1249_v46 = vsel %vm1248_vm11, %v1570_v8, %v1245_v20  ;;  %v1052_v17 = vpop.f32.mrf.mxu2  ;;  %v1292_v8 = vmul.f32 %v1209_v9, %v2472_v13  ;;  %v1170_v13 = vadd.f32 %v2547_v54, %v1169_v3  ;;  %vm1261_vm14 = vweird.f32 %v2565_v29 }
 0x24a   :  { %v1254_v56 = vsel %vm1251_vm1, %v1253_v12, %v1249_v46  ;;  %v2597_v41 = vadd.f32 %v1052_v17, %v2465_v2  ;;  %v1124_v2 = vmul.f32 %v2536_v26, %v1123_v31  ;;  %v1215_v37 = vadd.f32 %v2568_v58, %v1214_v16  ;;  %vm2672_vm1 = vmor %vm1126_vm7, %vm1127_vm0 }
 0x24b   :  { %v1295_v21 = vmul.f32 %v1254_v56, %v2486_v1  ;;  %v1578_v18 = vpop.eup %1577  ;;  %v1268_v61 = vor.u32 1.1754944e-38, %v1267_v48  ;;  %vm2844_vm11 = vcmask 261120   ;;  %vm1266_vm15 = vcmp.eq.f32.partialorder %v1265_v15, 8.507059e+37 }
 0x24c   :  { %v1482_v40 = vmul.f32 -1.442695, %v2597_v41  ;;  %v1580_v60 = vpop.eup %1579  ;;  %v1257_v1 = vmul.f32 %v1578_v18, %v2565_v29  ;;  %vm1262_vm8 = vweird.f32 %v1578_v18  ;;  %v1125_v22 = vadd.f32 %v2536_v26, %v1124_v2  ;;  %vm2847_vm3 = vmmov %vm2844_vm11 }
 0x24d   :  { %1321 = vmatpush.msrb.mxu3 %v1295_v21  ;;  %v1582_v44 = vpop.eup %1581  ;;  %v2620_v47 = vadd.f32 1.0, %v1580_v60  ;;  %v1219_v4 = vsel %vm2634_vm4, %v2568_v58, %v1215_v37  ;;  %vm1263_vm6 = vmor %vm1261_vm14, %vm1262_vm8  ;;  %v1178_v19 = vor.u32 1.1754944e-38, %v1177_v34  ;;  %vm1176_vm2 = vcmp.eq.f32.partialorder %v1175_v55, 8.507059e+37 }
 0x24e   :  { %1583 = vpow2.f32 %v1482_v40  ;;  %v1258_v5 = vsub.f32 1.0, %v1257_v1  ;;  %v2623_v53 = vadd.f32 1.0, %v1582_v44  ;;  %v1224_v36 = vsel %vm2638_vm10, %v1223_v38, %v1219_v4 }
 0x24f   :  { %1322 = vmatpush.msrb.mxu3 %v1292_v8  ;;  %1585 = vrcp.f32 %v2620_v47  ;;  %v1129_v63 = vsel %vm2672_vm1, %v2536_v26, %v1125_v22  ;;  %v1133_v12 = vor.u32 1.1754944e-38, %v1132_v6  ;;  %vm1131_vm0 = vcmp.eq.f32.partialorder %v1130_v24, 8.507059e+37 }
 0x250   :  { %v1259_v30 = vmul.f32 %v1578_v18, %v1258_v5  ;;  %1587 = vrcp.f32 %v2623_v53  ;;  %v1293_v46 = vmul.f32 %v1224_v36, %v2491_v10  ;;  %vm1141_vm7 = vweird.f32 %v2620_v47  ;;  %v1303_v36 = vpop.permute.xlu1 %1302 }
 0x251   :  { %1323 = vmatpush.msrb.mxu3 %v1289_v50  ;;  %v1055_v0 = vpop.f32.mrf.mxu2  ;;  %v1134_v9 = vsel %vm1131_vm0, %v1133_v12, %v1129_v63  ;;  %vm1186_vm10 = vweird.f32 %v2623_v53  ;;  %v1190_v59 = vand.u32 2147483647, %v2623_v53  ;;  %v1192_v5 = vand.u32 2147483648, %v2623_v53 }
 0x252   :  { %v2643_v23 = vadd.f32 %v1055_v0, %v2449_v62  ;;  %v1260_v14 = vadd.f32 %v1578_v18, %v1259_v30  ;;  %v1174_v62 = vsel %vm2649_vm13, %v2547_v54, %v1170_v13  ;;  %v1287_v35 = vmul.f32 %v1134_v9, %v2468_v7 }
 0x253   :  { %1324 = vmatpush.msrb.mxu3 %v1286_v39  ;;  %v1179_v31 = vsel %vm1176_vm2, %v1178_v19, %v1174_v62  ;;  %v1145_v22 = vand.u32 2147483647, %v2620_v47  ;;  %v1193_v4 = vor.u32 1.1754944e-38, %v1192_v5  ;;  %vm1191_vm0 = vcmp.eq.f32.partialorder %v1190_v59, 8.507059e+37 }
 0x254   :  { %v1584_v27 = vpop.eup %1583  ;;  %v1485_v42 = vmul.f32 -1.442695, %v2643_v23  ;;  %1486 = vmatmul.msk.f32.vlgmr.msrb.gmra.mxu3 %vm2844_vm11, %v2628_v45  ;;  %v1264_v58 = vsel %vm1263_vm6, %v1578_v18, %v1260_v14  ;;  %v1290_v26 = vmul.f32 %v1179_v31, %v2475_v25 }
 0x255   :  { %v2666_v29 = vadd.f32 1.0, %v1584_v27  ;;  %v1269_v20 = vsel %vm1266_vm15, %v1268_v61, %v1264_v58  ;;  %v2688_v17 = vpop.eup %1585 }
 0x256   :  { %1589 = vpow2.f32 %v1485_v42  ;;  %v1296_v11 = vmul.f32 %v1269_v20, %v2506_v49  ;;  %v2690_v56 = vpop.eup %1587  ;;  %v1137_v24 = vmul.f32 %v2688_v17, %v2620_v47  ;;  %vm1142_vm4 = vweird.f32 %v2688_v17 }
 0x257   :  { %1591 = vrcp.f32 %v2666_v29  ;;  %v1182_v28 = vmul.f32 %v2690_v56, %v2623_v53  ;;  %vm1187_vm9 = vweird.f32 %v2690_v56  ;;  %vm1231_vm5 = vweird.f32 %v2666_v29  ;;  %vm1143_vm2 = vmor %vm1141_vm7, %vm1142_vm4 }
 0x258   :  { %1341 = vmatpush.msra.mxu3 %v1296_v11  ;;  %v1138_v21 = vsub.f32 1.0, %v1137_v24  ;;  %v1235_v8 = vand.u32 2147483647, %v2666_v29  ;;  %v1237_v1 = vand.u32 2147483648, %v2666_v29  ;;  %vm2720_vm14 = vmor %vm1186_vm10, %vm1187_vm9  ;;  %v1147_v53 = vand.u32 2147483648, %v2620_v47 }
 0x259   :  { %v1183_v25 = vsub.f32 1.0, %v1182_v28  ;;  %vm2852_vm7 = vcmask 261120   ;;  %vm1387_vm9 = vcmask 1043456  }
 0x25a   :  { %1342 = vmatpush.msra.mxu3 %v1293_v46  ;;  %v1139_v60 = vmul.f32 %v2688_v17, %v1138_v21  ;;  %v1238_v34 = vor.u32 1.1754944e-38, %v1237_v1  ;;  %vm1236_vm15 = vcmp.eq.f32.partialorder %v1235_v8, 8.507059e+37  ;;  %v1148_v61 = vor.u32 1.1754944e-38, %v1147_v53 }
 0x25b   :  { %v1184_v3 = vmul.f32 %v2690_v56, %v1183_v25 }
 0x25c   :  { %v1590_v49 = vpop.eup %1589  ;;  %1343 = vmatpush.msra.mxu3 %v1290_v26  ;;  %v1140_v48 = vadd.f32 %v2688_v17, %v1139_v60 }
 0x25d   :  { %v1592_v39 = vpop.eup %1591  ;;  %v1105_v6 = vadd.f32 1.0, %v1590_v49  ;;  %v1185_v50 = vadd.f32 %v2690_v56, %v1184_v3 }
 0x25e   :  { %v1227_v10 = vmul.f32 %v1592_v39, %v2666_v29  ;;  %1344 = vmatpush.msra.mxu3 %v1287_v35  ;;  %vm1232_vm12 = vweird.f32 %v1592_v39  ;;  %v1144_v27 = vsel %vm1143_vm2, %v2688_v17, %v1140_v48 }
 0x25f   :  { %1593 = vrcp.f32 %v1105_v6  ;;  %1487 = vmatmul.msk.f32.vlgmr.msra.gmra.mxu3 %vm2847_vm3, %v2628_v45  ;;  %v1282_v44 = vand.u32 2147483648, %v1105_v6  ;;  %v1280_v37 = vand.u32 2147483647, %v1105_v6  ;;  %vm2713_vm13 = vmor %vm1231_vm5, %vm1232_vm12  ;;  %vm1276_vm6 = vweird.f32 %v1105_v6 }
 0x260   :  { %v1228_v16 = vsub.f32 1.0, %v1227_v10  ;;  %v1189_v57 = vsel %vm2720_vm14, %v2690_v56, %v1185_v50  ;;  %vm1146_vm3 = vcmp.eq.f32.partialorder %v1145_v22, 8.507059e+37  ;;  %v1596_v56 = vld [vmem:[%s2766_s0 + $0x8] sm:$0x7] }
 0x261   :  { %v1283_v51 = vor.u32 1.1754944e-38, %v1282_v44  ;;  %vm1281_vm1 = vcmp.eq.f32.partialorder %v1280_v37, 8.507059e+37  ;;  %v1194_v42 = vsel %vm1191_vm0, %v1193_v4, %v1189_v57  ;;  %v1149_v29 = vsel %vm1146_vm3, %v1148_v61, %v1144_v27 }
 0x262   :  { %v1229_v18 = vmul.f32 %v1592_v39, %v1228_v16  ;;  %v1291_v54 = vmul.f32 %v1194_v42, %v2557_v32  ;;  %v1288_v47 = vmul.f32 %v1149_v29, %v2542_v43  ;;  %v1595_v43 = vld [vmem:[%s2766_s0] sm:$0x77] }
 0x264   :  { %v1230_v2 = vadd.f32 %v1592_v39, %v1229_v18 }
 0x265   :  { %v1594_v7 = vpop.eup %1593 }
 0x266   :  { %v1272_v40 = vmul.f32 %v1594_v7, %v1105_v6  ;;  %vm1277_vm8 = vweird.f32 %v1594_v7  ;;  %v1234_v15 = vsel %vm2713_vm13, %v1592_v39, %v1230_v2 }
 0x267   :  { %vm1278_vm11 = vmor %vm1276_vm6, %vm1277_vm8  ;;  %v1239_v38 = vsel %vm1236_vm15, %v1238_v34, %v1234_v15 }
 0x268   :  { %v1273_v55 = vsub.f32 1.0, %v1272_v40  ;;  %v1294_v58 = vmul.f32 %v1239_v38, %v2597_v41 }
 0x26a   :  { %v1274_v52 = vmul.f32 %v1594_v7, %v1273_v55 }
 0x26c   :  { %v1275_v0 = vadd.f32 %v1594_v7, %v1274_v52 }
 0x26e   :  { %v1279_v33 = vsel %vm1278_vm11, %v1594_v7, %v1275_v0 }
 0x26f   :  { %v1284_v14 = vsel %vm1281_vm1, %v1283_v51, %v1279_v33 }
 0x270   :  { %v1297_v62 = vmul.f32 %v1284_v14, %v2643_v23  ;;  %v1305_v23 = vperm.slane %v1303_v36, 0 }
 0x272   :  { %1361 = vmatpush.msrb.mxu3 %v1297_v62 }
 0x274   :  { %1362 = vmatpush.msrb.mxu3 %v1294_v58 }
 0x276   :  { %1363 = vmatpush.msrb.mxu3 %v1291_v54 }
 0x278   :  { %1364 = vmatpush.msrb.mxu3 %v1288_v47 }
 0x279   :  { %1488 = vmatmul.msk.f32.vlgmr.msrb.gmra.mxu3 %vm2852_vm7, %v2628_v45 }
 0x2d7   :  { %v1326_v19 = vpop.f32.mrf.mxu3 }
 0x2d8   :  { %v1327_v63 = vadd.f32 %v1326_v19, %v1305_v23 }
 0x2da   :  { %v1381_v41 = vperm.slane %v1327_v63, 0 }
 0x2e2   :  { %v1346_v20 = vpop.f32.mrf.mxu3 }
 0x2e3   :  { %v1347_v11 = vadd.f32 %v1346_v20, %v1305_v23 }
 0x2e5   :  { %v1382_v12 = vperm.slane %v1347_v11, 0 }
 0x2e7   :  { %v1386_v31 = vrot.slane %v1382_v12, 4 }
 0x2e9   :  { %v1388_v46 = vsel %vm1387_vm9, %v1381_v41, %v1386_v31 }
 0x2ea   :  { %v1390_v32 = vmul.f32 %v1595_v43, %v1388_v46 }
 0x2ec   :  { %1392 = vst [vmem:[%s2771_s16] sm:$0x77] %v1390_v32 }
 0x2fc   :  { %v1366_v45 = vpop.f32.mrf.mxu3 }
 0x2fd   :  { %v1367_v17 = vadd.f32 %v1366_v45, %v1305_v23 }
 0x2ff   :  { %v1383_v9 = vperm.slane %v1367_v17, 0 }
 0x301   :  { %v1391_v26 = vmul.f32 %v1596_v56, %v1383_v9 }
 0x303   :  { %1393 = vst [vmem:[%s2771_s16 + $0x8] sm:$0x7] %v1391_v26 }

// kernel: egnn_layer_forward.4
= control target key start
LH: loop header
LB: loop body
LE: loop exit
PB: predicated region body
PF: predicated region fallthrough
CT: control target
= control target key end

     0   :  { %v249_v2 = vmov 0   ;;  %vm54_vm0 = vcmask 261120   ;;  %s388_s0 = inlined_call_operand.vmem [shape: f32[32,128], index: 0, kind: input, shape index: {}]   ;;  %s389_s2 = inlined_call_operand.vmem [shape: f32[32,1], index: 2, kind: input, shape index: {}]   ;;  %s390_s1 = inlined_call_operand.vmem [shape: f32[32,32], index: 1, kind: input, shape index: {}]   ;;  %s391_s4 = inlined_call_operand.<no memory space> [shape: f32[1,1], index: 4, kind: input, shape index: {}]   ;;  %s392_s3 = inlined_call_operand.vmem [shape: f32[1,32], index: 3, kind: input, shape index: {}]   ;;  %s393_s5 = inlined_call_operand.vmem [shape: f32[1,128], index: 5, kind: output, shape index: {}]  }
   0x1   :  { %v29_v0 = vld [vmem:[%s388_s0 + $0x18] sm:$0xff]  ;;  %v28_v1 = vld [vmem:[%s388_s0 + $0x10] sm:$0xff]  ;;  %231 = vset.pattern.permute.xlu1 %v249_v2  ;;  %230 = vset.pattern.permute.xlu0 %v249_v2  ;;  %v27_v3 = vld [vmem:[%s388_s0 + $0x8] sm:$0xff]  ;;  %v10_v35 = vstv %s391_s4 }
   0x2   :  { %79 = vmatpush.msra.mxu0 %v29_v0  ;;  %221 = vmatpush.msra.mxu2 %v29_v0  ;;  %v31_v4 = vld [vmem:[%s389_s2 + $0x8] sm:$0xff]  ;;  %v33_v5 = vld [vmem:[%s389_s2 + $0x18] sm:$0xff]  ;;  %v26_v6 = vld [vmem:[%s388_s0] sm:$0xff]  ;;  %11 = vst [vmem:[#allocation2] sm:$0x1] %v10_v35 }
   0x3   :  { %222 = vmatpush.msra.mxu3 %v29_v0  ;;  %232 = vset.pattern.permute.xlu2 %v249_v2  ;;  %v22_v7 = vld [vmem:[%s390_s1] sm:$0xff]  ;;  %v23_v8 = vld [vmem:[%s390_s1 + $0x8] sm:$0xff]  ;;  %v24_v9 = vld [vmem:[%s390_s1 + $0x10] sm:$0xff] }
   0x4   :  { %80 = vmatpush.msra.mxu0 %v28_v1  ;;  %223 = vmatpush.msra.mxu2 %v28_v1  ;;  %v30_v10 = vld [vmem:[%s389_s2] sm:$0xff]  ;;  %v32_v11 = vld [vmem:[%s389_s2 + $0x10] sm:$0xff]  ;;  %v25_v12 = vld [vmem:[%s390_s1 + $0x18] sm:$0xff] }
   0x5   :  { %224 = vmatpush.msra.mxu3 %v28_v1  ;;  %41 = vperm.xlu1 %231, %v31_v4  }
   0x6   :  { %81 = vmatpush.msra.mxu0 %v27_v3  ;;  %225 = vmatpush.msra.mxu2 %v27_v3 }
   0x7   :  { %226 = vmatpush.msra.mxu3 %v27_v3  ;;  %51 = vperm.xlu0 %230, %v33_v5  }
   0x8   :  { %82 = vmatpush.msra.mxu0 %v26_v6  ;;  %227 = vmatpush.msra.mxu2 %v26_v6 }
   0x9   :  { %228 = vmatpush.msra.mxu3 %v26_v6  ;;  %212 = vmatmul.msk.f32.vlgmr.msra.gmra.mxu0 %vm54_vm0, %v22_v7  ;;  %v177_v46 = vld [vmem:[#allocation2] sm:$0x1] }
   0xa   :  { %213 = vmatmul.msk.f32.vlgmr.msra.gmra.mxu2 %vm54_vm0, %v23_v8  ;;  %214 = vmatmul.msk.f32.vlgmr.msra.gmra.mxu3 %vm54_vm0, %v24_v9 }
   0xb   :  { %180 = vperm.xlu2 %232, %v177_v46  }
   0xd   :  { %36 = vperm.xlu1 %231, %v30_v10  }
   0xf   :  { %46 = vperm.xlu0 %230, %v32_v11  }
  0x12   :  { %215 = vmatmul.msk.f32.gmra.mxu3 %vm54_vm0, %v25_v12 }
  0x77   :  { %v42_v13 = vpop.permute.xlu1 %41 }
  0x79   :  { %v52_v14 = vpop.permute.xlu0 %51 }
  0x7f   :  { %v37_v15 = vpop.permute.xlu1 %36 }
  0x81   :  { %v47_v19 = vpop.permute.xlu0 %46 }
  0x86   :  { %v84_v16 = vpop.f32.mrf.mxu0 }
  0x87   :  { %v320_v17 = vadd.f32 %v84_v16, %v37_v15 }
  0x89   :  { %v216_v18 = vmul.f32 -1.442695, %v320_v17 }
  0x8b   :  { %233 = vpow2.f32 %v216_v18 }
  0x8d   :  { %v87_v20 = vpop.f32.mrf.mxu2  ;;  %v90_v21 = vpop.f32.mrf.mxu3 }
  0x8e   :  { %v323_v22 = vadd.f32 %v87_v20, %v42_v13  ;;  %v325_v23 = vadd.f32 %v90_v21, %v47_v19 }
  0x90   :  { %v217_v24 = vmul.f32 -1.442695, %v323_v22  ;;  %v218_v25 = vmul.f32 -1.442695, %v325_v23 }
  0x91   :  { %v234_v26 = vpop.eup %233 }
  0x92   :  { %235 = vpow2.f32 %v217_v24  ;;  %v329_v27 = vadd.f32 1.0, %v234_v26  ;;  %v181_v26 = vpop.permute.xlu2 %180 }
  0x93   :  { %237 = vpow2.f32 %v218_v25  ;;  %v176_v25 = vld [vmem:[%s392_s3] sm:$0x1] }
  0x94   :  { %239 = vrcp.f32 %v329_v27  ;;  %vm117_vm3 = vweird.f32 %v329_v27  ;;  %v121_v1 = vand.u32 2147483647, %v329_v27  ;;  %v123_v2 = vand.u32 2147483648, %v329_v27 }
  0x95   :  { %v93_v28 = vpop.f32.mrf.mxu3 }
  0x96   :  { %v331_v29 = vadd.f32 %v93_v28, %v52_v14  ;;  %v124_v14 = vor.u32 1.1754944e-38, %v123_v2 }
  0x98   :  { %v236_v30 = vpop.eup %235  ;;  %v219_v31 = vmul.f32 -1.442695, %v331_v29 }
  0x99   :  { %v238_v32 = vpop.eup %237  ;;  %v335_v33 = vadd.f32 1.0, %v236_v30 }
  0x9a   :  { %v110_v34 = vadd.f32 1.0, %v238_v32  ;;  %241 = vpow2.f32 %v219_v31  ;;  %v341_v36 = vpop.eup %239 }
  0x9b   :  { %243 = vrcp.f32 %v335_v33  ;;  %v113_v43 = vmul.f32 %v341_v36, %v329_v27  ;;  %vm132_vm2 = vweird.f32 %v335_v33  ;;  %vm118_vm4 = vweird.f32 %v341_v36 }
  0x9c   :  { %245 = vrcp.f32 %v110_v34  ;;  %vm147_vm1 = vweird.f32 %v110_v34  ;;  %v151_v56 = vand.u32 2147483647, %v110_v34  ;;  %v153_v57 = vand.u32 2147483648, %v110_v34  ;;  %vm350_vm8 = vmor %vm117_vm3, %vm118_vm4 }
  0x9d   :  { %v114_v48 = vsub.f32 1.0, %v113_v43  ;;  %v136_v63 = vand.u32 2147483647, %v335_v33  ;;  %v138_v0 = vand.u32 2147483648, %v335_v33  ;;  %v183_v27 = vperm.slane %v181_v26, 0 }
  0x9e   :  { %v154_v8 = vor.u32 1.1754944e-38, %v153_v57  ;;  %vm152_vm14 = vcmp.eq.f32.partialorder %v151_v56, 8.507059e+37 }
  0x9f   :  { %v115_v54 = vmul.f32 %v341_v36, %v114_v48  ;;  %v139_v13 = vor.u32 1.1754944e-38, %v138_v0  ;;  %vm137_vm15 = vcmp.eq.f32.partialorder %v136_v63, 8.507059e+37 }
  0xa0   :  { %v242_v37 = vpop.eup %241 }
  0xa1   :  { %v244_v38 = vpop.eup %243  ;;  %v111_v39 = vadd.f32 1.0, %v242_v37  ;;  %v116_v6 = vadd.f32 %v341_v36, %v115_v54 }
  0xa2   :  { %v246_v40 = vpop.eup %245  ;;  %v128_v41 = vmul.f32 %v244_v38, %v335_v33  ;;  %vm133_vm6 = vweird.f32 %v244_v38 }
  0xa3   :  { %247 = vrcp.f32 %v111_v39  ;;  %v143_v42 = vmul.f32 %v246_v40, %v110_v34  ;;  %vm148_vm5 = vweird.f32 %v246_v40  ;;  %v168_v55 = vand.u32 2147483648, %v111_v39  ;;  %vm367_vm11 = vmor %vm132_vm2, %vm133_vm6 }
  0xa4   :  { %v129_v45 = vsub.f32 1.0, %v128_v41  ;;  %v166_v59 = vand.u32 2147483647, %v111_v39  ;;  %vm355_vm9 = vmor %vm147_vm1, %vm148_vm5  ;;  %vm162_vm10 = vweird.f32 %v111_v39  ;;  %v120_v16 = vsel %vm350_vm8, %v341_v36, %v116_v6 }
  0xa5   :  { %v144_v44 = vsub.f32 1.0, %v143_v42  ;;  %v169_v7 = vor.u32 1.1754944e-38, %v168_v55  ;;  %vm122_vm1 = vcmp.eq.f32.partialorder %v121_v1, 8.507059e+37 }
  0xa6   :  { %v130_v51 = vmul.f32 %v244_v38, %v129_v45  ;;  %vm167_vm13 = vcmp.eq.f32.partialorder %v166_v59, 8.507059e+37  ;;  %v125_v20 = vsel %vm122_vm1, %v124_v14, %v120_v16 }
  0xa7   :  { %v145_v47 = vmul.f32 %v246_v40, %v144_v44  ;;  %v172_v24 = vmul.f32 %v125_v20, %v320_v17 }
  0xa8   :  { %v131_v60 = vadd.f32 %v244_v38, %v130_v51 }
  0xa9   :  { %v248_v49 = vpop.eup %247  ;;  %v146_v53 = vadd.f32 %v246_v40, %v145_v47 }
  0xaa   :  { %v158_v50 = vmul.f32 %v248_v49, %v111_v39  ;;  %vm163_vm7 = vweird.f32 %v248_v49  ;;  %v135_v10 = vsel %vm367_vm11, %v244_v38, %v131_v60 }
  0xab   :  { %v150_v4 = vsel %vm355_vm9, %v246_v40, %v146_v53  ;;  %vm164_vm12 = vmor %vm162_vm10, %vm163_vm7  ;;  %v140_v18 = vsel %vm137_vm15, %v139_v13, %v135_v10 }
  0xac   :  { %v159_v52 = vsub.f32 1.0, %v158_v50  ;;  %v155_v12 = vsel %vm152_vm14, %v154_v8, %v150_v4  ;;  %v173_v21 = vmul.f32 %v140_v18, %v323_v22 }
  0xad   :  { %v174_v19 = vmul.f32 %v155_v12, %v325_v23 }
  0xae   :  { %v160_v58 = vmul.f32 %v248_v49, %v159_v52 }
  0xb0   :  { %v161_v3 = vadd.f32 %v248_v49, %v160_v58 }
  0xb2   :  { %v165_v9 = vsel %vm164_vm12, %v248_v49, %v161_v3 }
  0xb3   :  { %v170_v11 = vsel %vm167_vm13, %v169_v7, %v165_v9 }
  0xb4   :  { %v175_v15 = vmul.f32 %v170_v11, %v331_v29 }
  0xb6   :  { %199 = vmatpush.msra.mxu1 %v175_v15 }
  0xb8   :  { %200 = vmatpush.msra.mxu1 %v174_v19 }
  0xba   :  { %201 = vmatpush.msra.mxu1 %v173_v21 }
  0xbc   :  { %202 = vmatpush.msra.mxu1 %v172_v24 }
  0xbd   :  { %220 = vmatmul.msk.f32.vlgmr.msra.gmra.mxu1 %vm54_vm0, %v176_v25 }
 0x13a   :  { %v204_v28 = vpop.f32.mrf.mxu1 }
 0x13b   :  { %v205_v29 = vadd.f32 %v204_v28, %v183_v27 }
 0x13d   :  { %207 = vst [vmem:[%s393_s5] sm:$0x1] %v205_v29 }

</bundles_post_ra>
